<compile_context>
chip_gen: v7x
topology: tpu7x:2x2x1
jax: 0.10.0
libtpu: 0.0.40
codegen_flags: <defaults>
</compile_context>

<pallas_src>
import functools

import jax
import jax.numpy as jnp
from jax.experimental import pallas as pl
from jax.experimental.pallas import tpu as pltpu


# ----------------------------------------------------------------------------
# One-time parameter packing (review item: hoist all per-call weight prep)
# ----------------------------------------------------------------------------

def _pack_params(params, num_heads):
    qkvp, tp, bp = params["qkv"], params["mha_top"], params["block"]
    mp = bp["mha"]
    H = qkvp["wq"].shape[0]
    I = bp["w_int"].shape[1]
    head_dim = H // num_heads
    scale = float(head_dim) ** -0.5

    lanes = max(4 * H, I, H)
    lanes = ((lanes + 127) // 128) * 128

    def zeros(r, c):
        return jnp.zeros((r, c), jnp.float32)

    def at_rows(w, start, total):
        # Place `w` at rows [start, start+rows) of a (total, cols) zero matrix
        # so it consumes the matching lane block of the fused qkv activation.
        return zeros(total, w.shape[1]).at[start:start + w.shape[0], :].set(w)

    pieces = []

    def add(name, arr):
        pieces.append((name, jnp.asarray(arr, jnp.float32)))

    # QKVLinear fused: result lanes [q | k | v | 0] == output-slab layout.
    add("w_qkv", jnp.concatenate(
        [qkvp["wq"], qkvp["wk"], qkvp["wv"], zeros(H, H)], axis=1))
    add("b_qkv", jnp.concatenate(
        [qkvp["bq"], qkvp["bk"], qkvp["bv"], jnp.zeros((H,), jnp.float32)]
    ).reshape(1, 4 * H))

    # Top-level MultiAttention.  wq consumes the (R, 4H) qkv slab directly
    # (q = lanes 0:H); head_dim**-0.5 is folded into wq/bq.
    add("t_wq", at_rows(tp["wq"] * scale, 0, 4 * H))
    add("t_bq", (tp["bq"] * scale).reshape(1, H))
    add("t_wk", tp["wk"]); add("t_bk", tp["bk"].reshape(1, H))
    add("t_wv", tp["wv"]); add("t_bv", tp["bv"].reshape(1, H))
    add("t_wo", tp["wo"]); add("t_bo", tp["bo"].reshape(1, H))

    # TangledBlock MultiAttention.
    add("m_wq", at_rows(mp["wq"] * scale, 0, 4 * H))
    add("m_bq", (mp["bq"] * scale).reshape(1, H))
    add("m_wk", mp["wk"]); add("m_bk", mp["bk"].reshape(1, H))
    add("m_wv", mp["wv"]); add("m_bv", mp["bv"].reshape(1, H))
    add("m_wo", mp["wo"]); add("m_bo", mp["bo"].reshape(1, H))

    # interact_{key,value}_linear: cat([k, interact]) @ W ==
    #   qkv @ W_k_padded (k lanes) + interact @ W_interact.
    add("w_ikk", at_rows(bp["w_ik"][:H, :], H, 4 * H))       # k at lanes H:2H
    add("w_iki", bp["w_ik"][H:, :])
    add("b_ik", bp["b_ik"].reshape(1, H))
    add("w_ivv", at_rows(bp["w_iv"][:H, :], 2 * H, 4 * H))   # v at lanes 2H:3H
    add("w_ivi", bp["w_iv"][H:, :])
    add("b_iv", bp["b_iv"].reshape(1, H))

    add("ln1_g", bp["ln1_g"].reshape(1, H)); add("ln1_b", bp["ln1_b"].reshape(1, H))
    add("w_int", bp["w_int"]); add("b_int", bp["b_int"].reshape(1, I))
    add("w_out", bp["w_out"]); add("b_out", bp["b_out"].reshape(1, H))
    add("ln2_g", bp["ln2_g"].reshape(1, H)); add("ln2_b", bp["ln2_b"].reshape(1, H))

    # Stack everything along sublanes; each piece padded to 8-aligned rows and
    # a common lane width so every in-kernel slice is tile-aligned (free).
    meta = {}
    blocks = []
    cur = 0
    for name, arr in pieces:
        r, c = arr.shape
        rp = ((r + 7) // 8) * 8
        blocks.append(jnp.zeros((rp, lanes), jnp.float32).at[:r, :c].set(arr))
        meta[name] = (cur, int(r), int(c))
        cur += rp
    slab = jnp.concatenate(blocks, axis=0)
    return slab, meta


# ----------------------------------------------------------------------------
# Fused Pallas kernel (whole module forward, eval mode, gridless)
# ----------------------------------------------------------------------------

def _guided_mha_kernel(hs_ref, ik_ref, iv_ref, slab_ref, out_ref, *,
                       batch, num_heads, head_dim, hidden, meta, eps):
    H = hidden
    f32 = jnp.float32

    def get(name):
        off, r, c = meta[name]
        return slab_ref[off:off + r, 0:c]

    def mm(a, b):
        return jnp.dot(a, b, preferred_element_type=f32)

    x = hs_ref[...]        # (R,  H)  row r -> (seq r // B, batch r % B)
    ik = ik_ref[...]       # (RK, H)
    iv = iv_ref[...]       # (RK, H)

    # Per-head lane masks (built once, VPU/iota only — no lane slicing).
    lane = jax.lax.broadcasted_iota(jnp.int32, (1, H), 1)
    head_masks = [
        ((lane >= h * head_dim) & (lane < (h + 1) * head_dim)).astype(f32)
        for h in range(num_heads)]

    def batch_bias(rows_q, rows_k):
        # Additive mask: 0 where query/key rows belong to the same batch,
        # -1e30 otherwise (exp underflows to exactly 0 -> per-batch softmax).
        qi = jax.lax.broadcasted_iota(jnp.int32, (rows_q, rows_k), 0)
        kj = jax.lax.broadcasted_iota(jnp.int32, (rows_q, rows_k), 1)
        same = (qi % batch) == (kj % batch)
        return jnp.where(same, f32(0.0), f32(-1e30))

    def attend(qp, kp, vp, wo, bo):
        # qp: (R, H) already scaled (scale folded into wq); kp/vp: (RK, H).
        bias = batch_bias(qp.shape[0], kp.shape[0])
        ctx = jnp.zeros((qp.shape[0], H), f32)
        for hm in head_masks:                     # static unroll over heads
            s = jax.lax.dot_general(qp * hm, kp, (((1,), (1,)), ((), ())),
                                    preferred_element_type=f32) + bias
            m = jnp.max(s, axis=-1, keepdims=True)
            p = jnp.exp(s - m)
            p = p * pl.reciprocal(jnp.sum(p, axis=-1, keepdims=True))
            # TODO(synk): attention dropout (p=0.4) skipped (eval identity).
            ctx = ctx + mm(p, vp * hm)            # head ctx lands at its lanes
        return mm(ctx, wo) + bo                   # ONE merged output projection

    def layernorm(t, g, b):
        mu = jnp.mean(t, axis=-1, keepdims=True)
        var = jnp.mean((t - mu) ** 2, axis=-1, keepdims=True)
        return (t - mu) * jax.lax.rsqrt(var + eps) * g + b

    # --- QKVLinear: one lane-dense matmul; lanes = [q | k | v | 0] ---
    qkv = mm(x, get("w_qkv")) + get("b_qkv")      # (R, 4H)

    # --- guide attention: MultiAttention(q, interact_key, interact_value) ---
    qp_t = mm(qkv, get("t_wq")) + get("t_bq")
    kp_t = mm(ik, get("t_wk")) + get("t_bk")
    vp_t = mm(iv, get("t_wv")) + get("t_bv")
    interact = attend(qp_t, kp_t, vp_t, get("t_wo"), get("t_bo"))

    # --- TangledBlock: cat([k, interact]) @ W == qkv @ W_pad + interact @ W ---
    kk = mm(qkv, get("w_ikk")) + mm(interact, get("w_iki")) + get("b_ik")
    vv = mm(qkv, get("w_ivv")) + mm(interact, get("w_ivi")) + get("b_iv")

    # --- second attention: MultiAttention(q, kk, vv) ---
    qp_m = mm(qkv, get("m_wq")) + get("m_bq")
    kp_m = mm(kk, get("m_wk")) + get("m_bk")
    vp_m = mm(vv, get("m_wv")) + get("m_bv")
    attn_out = attend(qp_m, kp_m, vp_m, get("m_wo"), get("m_bo"))

    # --- residual + LN1 + FFN + LN2 ---
    q = qkv[:, 0:H]                               # lane offset 0: free narrow
    norm = layernorm(attn_out + q + kk + vv, get("ln1_g"), get("ln1_b"))
    mid = jnp.maximum(mm(norm, get("w_int")) + get("b_int"), 0.0)
    dense = mm(mid, get("w_out")) + get("b_out")
    # TODO(synk): Output.dropout skipped (eval identity).
    out = layernorm(dense + norm, get("ln2_g"), get("ln2_b"))

    # --- lane-dense (R, 4H) output slab: [hidden | k | v | 0] ---
    out_ref[...] = qkv                            # k, v, zero pad already placed
    out_ref[:, 0:H] = out                         # overwrite q lanes with hidden


# ----------------------------------------------------------------------------
# Forward factory: one pallas_call, wrapper only does free reshapes + slices
# ----------------------------------------------------------------------------

def make_guided_mha_forward(meta, num_heads, eps):
    @jax.jit
    def forward(slab, hidden_state, interact_key, interact_value):
        L, B, H = hidden_state.shape
        LK = interact_key.shape[0]
        R, RK = L * B, LK * B

        # (L, B, H) -> (L*B, H): pure row-major reshape, no transpose/copy.
        hs2 = hidden_state.reshape(R, H)
        ik2 = interact_key.reshape(RK, H)
        iv2 = interact_value.reshape(RK, H)

        kernel = functools.partial(
            _guided_mha_kernel, batch=B, num_heads=num_heads,
            head_dim=H // num_heads, hidden=H, meta=meta, eps=eps)

        vmem = pl.BlockSpec(memory_space=pltpu.MemorySpace.VMEM)
        out = pl.pallas_call(
            kernel,
            out_shape=jax.ShapeDtypeStruct((R, 4 * H), jnp.float32),
            in_specs=[vmem, vmem, vmem, vmem],
            out_specs=vmem,
        )(hs2, ik2, iv2, slab)

        hid = out[:, 0:H].reshape(L, B, H)
        k_out = out[:, H:2 * H].reshape(L, B, H)
        v_out = out[:, 2 * H:3 * H].reshape(L, B, H)
        return hid, k_out, v_out

    return forward


# ----------------------------------------------------------------------------
# Pure-JAX reference (for correctness check)
# ----------------------------------------------------------------------------

def _ref_ln(x, g, b, eps):
    m = x.mean(-1, keepdims=True)
    v = ((x - m) ** 2).mean(-1, keepdims=True)
    return (x - m) / jnp.sqrt(v + eps) * g + b


def _ref_mha(query, key, value, p, num_heads):
    Lq, B, E = query.shape
    Lk = key.shape[0]
    hd = E // num_heads
    scale = float(hd) ** -0.5
    q = query @ p["wq"] + p["bq"]
    k = key @ p["wk"] + p["bk"]
    v = value @ p["wv"] + p["bv"]
    qh = q.reshape(Lq, B, num_heads, hd).transpose(1, 2, 0, 3) * scale
    kh = k.reshape(Lk, B, num_heads, hd).transpose(1, 2, 0, 3)
    vh = v.reshape(Lk, B, num_heads, hd).transpose(1, 2, 0, 3)
    s = jnp.einsum("bhqd,bhkd->bhqk", qh, kh)
    p_attn = jax.nn.softmax(s, axis=-1)
    o = jnp.einsum("bhqk,bhkd->bhqd", p_attn, vh)
    o = o.transpose(2, 0, 1, 3).reshape(Lq, B, E)
    return o @ p["wo"] + p["bo"]


def _ref_forward(params, hidden_state, ik, iv, num_heads, eps):
    q = hidden_state @ params["qkv"]["wq"] + params["qkv"]["bq"]
    k = hidden_state @ params["qkv"]["wk"] + params["qkv"]["bk"]
    v = hidden_state @ params["qkv"]["wv"] + params["qkv"]["bv"]
    interact = _ref_mha(q, ik, iv, params["mha_top"], num_heads)
    bp = params["block"]
    key_cat = jnp.concatenate([k, interact], axis=2)
    val_cat = jnp.concatenate([v, interact], axis=2)
    kk = key_cat @ bp["w_ik"] + bp["b_ik"]
    vv = val_cat @ bp["w_iv"] + bp["b_iv"]
    attn_out = _ref_mha(q, kk, vv, bp["mha"], num_heads)
    norm = _ref_ln(attn_out + q + kk + vv, bp["ln1_g"], bp["ln1_b"], eps)
    mid = jnp.maximum(norm @ bp["w_int"] + bp["b_int"], 0.0)
    dense_out = mid @ bp["w_out"] + bp["b_out"]
    out = _ref_ln(dense_out + norm, bp["ln2_g"], bp["ln2_b"], eps)
    return out, k, v


# ----------------------------------------------------------------------------
# Deterministic parameter init
# ----------------------------------------------------------------------------

def _init_params(key, H, I):
    ks = iter(jax.random.split(key, 64))

    def w(shape, scale=0.05):
        return jax.random.normal(next(ks), shape, jnp.float32) * scale

    def mha_params():
        return {"wq": w((H, H)), "bq": w((H,)),
                "wk": w((H, H)), "bk": w((H,)),
                "wv": w((H, H)), "bv": w((H,)),
                "wo": w((H, H)), "bo": w((H,))}

    return {
        "qkv": {"wq": w((H, H)), "bq": w((H,)),
                "wk": w((H, H)), "bk": w((H,)),
                "wv": w((H, H)), "bv": w((H,))},
        "mha_top": mha_params(),
        "block": {
            "mha": mha_params(),
            "w_ik": w((2 * H, H)), "b_ik": w((H,)),
            "w_iv": w((2 * H, H)), "b_iv": w((H,)),
            "ln1_g": jnp.ones((H,), jnp.float32), "ln1_b": jnp.zeros((H,), jnp.float32),
            "w_int": w((H, I)), "b_int": w((I,)),
            "w_out": w((I, H)), "b_out": w((H,)),
            "ln2_g": jnp.ones((H,), jnp.float32), "ln2_b": jnp.zeros((H,), jnp.float32),
        },
    }


# ----------------------------------------------------------------------------
# Main
# ----------------------------------------------------------------------------

if __name__ == "__main__":
    L, B, H = 8, 2, 32            # seq_len, batch, hidden_size
    LK = 8                        # interact key/value seq len
    NUM_HEADS = 4
    INTERMEDIATE = 64
    EPS = 1e-12

    root = jax.random.PRNGKey(0)
    k_param, k_hs, k_ik, k_iv = jax.random.split(root, 4)

    params = _init_params(k_param, H, INTERMEDIATE)
    hidden_state = jax.random.normal(k_hs, (L, B, H), jnp.float32)
    interact_key = jax.random.normal(k_ik, (LK, B, H), jnp.float32)
    interact_value = jax.random.normal(k_iv, (LK, B, H), jnp.float32)

    # One-time param packing (hoisted out of the per-call forward).
    slab, meta = _pack_params(params, NUM_HEADS)
    slab = jax.block_until_ready(slab)

    fwd = make_guided_mha_forward(meta, NUM_HEADS, EPS)
    hidden, key_out, value_out = fwd(slab, hidden_state, interact_key, interact_value)
    jax.block_until_ready((hidden, key_out, value_out))

    # correctness check against pure-JAX reference
    ref_hidden, ref_key, ref_value = _ref_forward(
        params, hidden_state, interact_key, interact_value, NUM_HEADS, EPS)

    assert hidden.shape == (L, B, H)
    assert key_out.shape == (L, B, H) and value_out.shape == (L, B, H)
    assert jnp.allclose(hidden, ref_hidden, atol=1e-4, rtol=1e-4), \
        float(jnp.max(jnp.abs(hidden - ref_hidden)))
    assert jnp.allclose(key_out, ref_key, atol=1e-4, rtol=1e-4)
    assert jnp.allclose(value_out, ref_value, atol=1e-4, rtol=1e-4)

    print("KERNEL_OK")
</pallas_src>

<mosaic_0001>
module attributes {stable_mosaic.version = 11 : i64} {
  func.func @_guided_mha_kernel(%arg0: memref<16x32xf32, #tpu.memory_space<vmem>>, %arg1: memref<16x32xf32, #tpu.memory_space<vmem>>, %arg2: memref<16x32xf32, #tpu.memory_space<vmem>>, %arg3: memref<1032x128xf32, #tpu.memory_space<vmem>>, %arg4: memref<16x128xf32, #tpu.memory_space<vmem>>) attributes {dimension_semantics = [], scalar_prefetch = 0 : i64, scratch_operands = 0 : i64, tpu.core_type = #tpu.core_type<tc>} {
    %c0 = arith.constant 0 : index
    %c0_0 = arith.constant 0 : index
    %0 = vector.load %arg0[%c0, %c0_0] : memref<16x32xf32, #tpu.memory_space<vmem>>, vector<16x32xf32>
    %c0_1 = arith.constant 0 : index
    %c0_2 = arith.constant 0 : index
    %1 = vector.load %arg1[%c0_1, %c0_2] : memref<16x32xf32, #tpu.memory_space<vmem>>, vector<16x32xf32>
    %c0_3 = arith.constant 0 : index
    %c0_4 = arith.constant 0 : index
    %2 = vector.load %arg2[%c0_3, %c0_4] : memref<16x32xf32, #tpu.memory_space<vmem>>, vector<16x32xf32>
    %3 = tpu.iota {dimensions = array<i32: 1>} : vector<1x32xi32>
    %c0_i32 = arith.constant 0 : i32
    %4 = vector.broadcast %c0_i32 : i32 to vector<1x32xi32>
    %5 = arith.cmpi sge, %3, %4 : vector<1x32xi32>
    %c8_i32 = arith.constant 8 : i32
    %6 = vector.broadcast %c8_i32 : i32 to vector<1x32xi32>
    %7 = arith.cmpi slt, %3, %6 : vector<1x32xi32>
    %8 = arith.andi %5, %7 : vector<1x32xi1>
    %9 = arith.extui %8 : vector<1x32xi1> to vector<1x32xi32>
    %10 = arith.sitofp %9 : vector<1x32xi32> to vector<1x32xf32>
    %c8_i32_5 = arith.constant 8 : i32
    %11 = vector.broadcast %c8_i32_5 : i32 to vector<1x32xi32>
    %12 = arith.cmpi sge, %3, %11 : vector<1x32xi32>
    %c16_i32 = arith.constant 16 : i32
    %13 = vector.broadcast %c16_i32 : i32 to vector<1x32xi32>
    %14 = arith.cmpi slt, %3, %13 : vector<1x32xi32>
    %15 = arith.andi %12, %14 : vector<1x32xi1>
    %16 = arith.extui %15 : vector<1x32xi1> to vector<1x32xi32>
    %17 = arith.sitofp %16 : vector<1x32xi32> to vector<1x32xf32>
    %c16_i32_6 = arith.constant 16 : i32
    %18 = vector.broadcast %c16_i32_6 : i32 to vector<1x32xi32>
    %19 = arith.cmpi sge, %3, %18 : vector<1x32xi32>
    %c24_i32 = arith.constant 24 : i32
    %20 = vector.broadcast %c24_i32 : i32 to vector<1x32xi32>
    %21 = arith.cmpi slt, %3, %20 : vector<1x32xi32>
    %22 = arith.andi %19, %21 : vector<1x32xi1>
    %23 = arith.extui %22 : vector<1x32xi1> to vector<1x32xi32>
    %24 = arith.sitofp %23 : vector<1x32xi32> to vector<1x32xf32>
    %c24_i32_7 = arith.constant 24 : i32
    %25 = vector.broadcast %c24_i32_7 : i32 to vector<1x32xi32>
    %26 = arith.cmpi sge, %3, %25 : vector<1x32xi32>
    %c32_i32 = arith.constant 32 : i32
    %27 = vector.broadcast %c32_i32 : i32 to vector<1x32xi32>
    %28 = arith.cmpi slt, %3, %27 : vector<1x32xi32>
    %29 = arith.andi %26, %28 : vector<1x32xi1>
    %30 = arith.extui %29 : vector<1x32xi1> to vector<1x32xi32>
    %31 = arith.sitofp %30 : vector<1x32xi32> to vector<1x32xf32>
    %c0_8 = arith.constant 0 : index
    %c0_9 = arith.constant 0 : index
    %32 = vector.load %arg3[%c0_8, %c0_9] : memref<1032x128xf32, #tpu.memory_space<vmem>>, vector<32x128xf32>
    %cst = arith.constant dense<0.000000e+00> : vector<16x128xf32>
    %33 = tpu.matmul %0, %32, %cst {dimension_numbers = #tpu.dot_dimension_numbers<[1], [0], [0], [1], [0, 0, 1, 1], [], []>} : vector<16x32xf32>, vector<32x128xf32>, vector<16x128xf32> -> vector<16x128xf32>
    %c32 = arith.constant 32 : index
    %c0_10 = arith.constant 0 : index
    %34 = vector.load %arg3[%c32, %c0_10] : memref<1032x128xf32, #tpu.memory_space<vmem>>, vector<1x128xf32>
    %35 = vector.broadcast %34 : vector<1x128xf32> to vector<16x128xf32>
    %36 = arith.addf %33, %35 : vector<16x128xf32>
    %c40 = arith.constant 40 : index
    %c0_11 = arith.constant 0 : index
    %37 = vector.load %arg3[%c40, %c0_11] : memref<1032x128xf32, #tpu.memory_space<vmem>>, vector<128x32xf32>
    %cst_12 = arith.constant dense<0.000000e+00> : vector<16x32xf32>
    %38 = tpu.matmul %36, %37, %cst_12 {dimension_numbers = #tpu.dot_dimension_numbers<[1], [0], [0], [1], [0, 0, 1, 1], [], []>} : vector<16x128xf32>, vector<128x32xf32>, vector<16x32xf32> -> vector<16x32xf32>
    %c168 = arith.constant 168 : index
    %c0_13 = arith.constant 0 : index
    %39 = vector.load %arg3[%c168, %c0_13] : memref<1032x128xf32, #tpu.memory_space<vmem>>, vector<1x32xf32>
    %40 = vector.broadcast %39 : vector<1x32xf32> to vector<16x32xf32>
    %41 = arith.addf %38, %40 : vector<16x32xf32>
    %c176 = arith.constant 176 : index
    %c0_14 = arith.constant 0 : index
    %42 = vector.load %arg3[%c176, %c0_14] : memref<1032x128xf32, #tpu.memory_space<vmem>>, vector<32x32xf32>
    %cst_15 = arith.constant dense<0.000000e+00> : vector<16x32xf32>
    %43 = tpu.matmul %1, %42, %cst_15 {dimension_numbers = #tpu.dot_dimension_numbers<[1], [0], [0], [1], [0, 0, 1, 1], [], []>} : vector<16x32xf32>, vector<32x32xf32>, vector<16x32xf32> -> vector<16x32xf32>
    %c208 = arith.constant 208 : index
    %c0_16 = arith.constant 0 : index
    %44 = vector.load %arg3[%c208, %c0_16] : memref<1032x128xf32, #tpu.memory_space<vmem>>, vector<1x32xf32>
    %45 = vector.broadcast %44 : vector<1x32xf32> to vector<16x32xf32>
    %46 = arith.addf %43, %45 : vector<16x32xf32>
    %c216 = arith.constant 216 : index
    %c0_17 = arith.constant 0 : index
    %47 = vector.load %arg3[%c216, %c0_17] : memref<1032x128xf32, #tpu.memory_space<vmem>>, vector<32x32xf32>
    %cst_18 = arith.constant dense<0.000000e+00> : vector<16x32xf32>
    %48 = tpu.matmul %2, %47, %cst_18 {dimension_numbers = #tpu.dot_dimension_numbers<[1], [0], [0], [1], [0, 0, 1, 1], [], []>} : vector<16x32xf32>, vector<32x32xf32>, vector<16x32xf32> -> vector<16x32xf32>
    %c248 = arith.constant 248 : index
    %c0_19 = arith.constant 0 : index
    %49 = vector.load %arg3[%c248, %c0_19] : memref<1032x128xf32, #tpu.memory_space<vmem>>, vector<1x32xf32>
    %50 = vector.broadcast %49 : vector<1x32xf32> to vector<16x32xf32>
    %51 = arith.addf %48, %50 : vector<16x32xf32>
    %c256 = arith.constant 256 : index
    %c0_20 = arith.constant 0 : index
    %52 = vector.load %arg3[%c256, %c0_20] : memref<1032x128xf32, #tpu.memory_space<vmem>>, vector<32x32xf32>
    %c288 = arith.constant 288 : index
    %c0_21 = arith.constant 0 : index
    %53 = vector.load %arg3[%c288, %c0_21] : memref<1032x128xf32, #tpu.memory_space<vmem>>, vector<1x32xf32>
    %54 = tpu.iota {dimensions = array<i32: 0>} : vector<16x16xi32>
    %55 = tpu.iota {dimensions = array<i32: 1>} : vector<16x16xi32>
    %c2_i32 = arith.constant 2 : i32
    %c0_i32_22 = arith.constant 0 : i32
    %56 = arith.cmpi eq, %c2_i32, %c0_i32_22 : i32
    %c1_i32 = arith.constant 1 : i32
    %57 = arith.select %56, %c1_i32, %c2_i32 : i32
    %58 = vector.broadcast %57 : i32 to vector<16x16xi32>
    %59 = arith.remsi %54, %58 : vector<16x16xi32>
    %c0_i32_23 = arith.constant 0 : i32
    %60 = vector.broadcast %c0_i32_23 : i32 to vector<16x16xi32>
    %61 = arith.cmpi ne, %59, %60 : vector<16x16xi32>
    %c0_i32_24 = arith.constant 0 : i32
    %62 = vector.broadcast %c0_i32_24 : i32 to vector<16x16xi32>
    %63 = arith.cmpi slt, %59, %62 : vector<16x16xi32>
    %c0_i32_25 = arith.constant 0 : i32
    %64 = arith.cmpi slt, %57, %c0_i32_25 : i32
    %65 = vector.broadcast %64 : i1 to vector<16x16xi1>
    %66 = vector.broadcast %65 : vector<16x16xi1> to vector<16x16xi1>
    %67 = arith.xori %63, %66 : vector<16x16xi1>
    %68 = arith.andi %67, %61 : vector<16x16xi1>
    %69 = vector.broadcast %57 : i32 to vector<16x16xi32>
    %70 = arith.addi %59, %69 : vector<16x16xi32>
    %71 = arith.select %68, %70, %59 : vector<16x16xi1>, vector<16x16xi32>
    %c2_i32_26 = arith.constant 2 : i32
    %c0_i32_27 = arith.constant 0 : i32
    %72 = arith.cmpi eq, %c2_i32_26, %c0_i32_27 : i32
    %c1_i32_28 = arith.constant 1 : i32
    %73 = arith.select %72, %c1_i32_28, %c2_i32_26 : i32
    %74 = vector.broadcast %73 : i32 to vector<16x16xi32>
    %75 = arith.remsi %55, %74 : vector<16x16xi32>
    %c0_i32_29 = arith.constant 0 : i32
    %76 = vector.broadcast %c0_i32_29 : i32 to vector<16x16xi32>
    %77 = arith.cmpi ne, %75, %76 : vector<16x16xi32>
    %c0_i32_30 = arith.constant 0 : i32
    %78 = vector.broadcast %c0_i32_30 : i32 to vector<16x16xi32>
    %79 = arith.cmpi slt, %75, %78 : vector<16x16xi32>
    %c0_i32_31 = arith.constant 0 : i32
    %80 = arith.cmpi slt, %73, %c0_i32_31 : i32
    %81 = vector.broadcast %80 : i1 to vector<16x16xi1>
    %82 = vector.broadcast %81 : vector<16x16xi1> to vector<16x16xi1>
    %83 = arith.xori %79, %82 : vector<16x16xi1>
    %84 = arith.andi %83, %77 : vector<16x16xi1>
    %85 = vector.broadcast %73 : i32 to vector<16x16xi32>
    %86 = arith.addi %75, %85 : vector<16x16xi32>
    %87 = arith.select %84, %86, %75 : vector<16x16xi1>, vector<16x16xi32>
    %88 = arith.cmpi eq, %71, %87 : vector<16x16xi32>
    %cst_32 = arith.constant 0.000000e+00 : f32
    %cst_33 = arith.constant -1.000000e+30 : f32
    %89 = vector.broadcast %cst_32 : f32 to vector<16x16xf32>
    %90 = vector.broadcast %cst_33 : f32 to vector<16x16xf32>
    %91 = arith.select %88, %89, %90 : vector<16x16xi1>, vector<16x16xf32>
    %cst_34 = arith.constant 0.000000e+00 : f32
    %92 = vector.broadcast %cst_34 : f32 to vector<16x32xf32>
    %93 = vector.broadcast %10 : vector<1x32xf32> to vector<16x32xf32>
    %94 = arith.mulf %41, %93 : vector<16x32xf32>
    %cst_35 = arith.constant dense<0.000000e+00> : vector<16x16xf32>
    %95 = tpu.matmul %94, %46, %cst_35 {dimension_numbers = #tpu.dot_dimension_numbers<[1], [1], [0], [0], [0, 0, 1, 0], [], []>} : vector<16x32xf32>, vector<16x32xf32>, vector<16x16xf32> -> vector<16x16xf32>
    %96 = arith.addf %95, %91 : vector<16x16xf32>
    %cst_36 = arith.constant dense<0xFF800000> : vector<16xf32>
    %97 = vector.multi_reduction <maximumf>, %96, %cst_36 [1] : vector<16x16xf32> to vector<16xf32>
    %98 = vector.shape_cast %97 : vector<16xf32> to vector<16x1xf32>
    %99 = vector.broadcast %98 : vector<16x1xf32> to vector<16x16xf32>
    %100 = arith.subf %96, %99 : vector<16x16xf32>
    %101 = math.exp %100 : vector<16x16xf32>
    %cst_37 = arith.constant dense<0.000000e+00> : vector<16xf32>
    %102 = vector.multi_reduction <add>, %101, %cst_37 [1] : vector<16x16xf32> to vector<16xf32>
    %103 = vector.shape_cast %102 : vector<16xf32> to vector<16x1xf32>
    %104 = tpu.reciprocal %103 : vector<16x1xf32> -> vector<16x1xf32>
    %105 = vector.broadcast %104 : vector<16x1xf32> to vector<16x16xf32>
    %106 = arith.mulf %101, %105 : vector<16x16xf32>
    %107 = vector.broadcast %10 : vector<1x32xf32> to vector<16x32xf32>
    %108 = arith.mulf %51, %107 : vector<16x32xf32>
    %cst_38 = arith.constant dense<0.000000e+00> : vector<16x32xf32>
    %109 = tpu.matmul %106, %108, %cst_38 {dimension_numbers = #tpu.dot_dimension_numbers<[1], [0], [0], [1], [0, 0, 1, 1], [], []>} : vector<16x16xf32>, vector<16x32xf32>, vector<16x32xf32> -> vector<16x32xf32>
    %110 = arith.addf %92, %109 : vector<16x32xf32>
    %111 = vector.broadcast %17 : vector<1x32xf32> to vector<16x32xf32>
    %112 = arith.mulf %41, %111 : vector<16x32xf32>
    %cst_39 = arith.constant dense<0.000000e+00> : vector<16x16xf32>
    %113 = tpu.matmul %112, %46, %cst_39 {dimension_numbers = #tpu.dot_dimension_numbers<[1], [1], [0], [0], [0, 0, 1, 0], [], []>} : vector<16x32xf32>, vector<16x32xf32>, vector<16x16xf32> -> vector<16x16xf32>
    %114 = arith.addf %113, %91 : vector<16x16xf32>
    %cst_40 = arith.constant dense<0xFF800000> : vector<16xf32>
    %115 = vector.multi_reduction <maximumf>, %114, %cst_40 [1] : vector<16x16xf32> to vector<16xf32>
    %116 = vector.shape_cast %115 : vector<16xf32> to vector<16x1xf32>
    %117 = vector.broadcast %116 : vector<16x1xf32> to vector<16x16xf32>
    %118 = arith.subf %114, %117 : vector<16x16xf32>
    %119 = math.exp %118 : vector<16x16xf32>
    %cst_41 = arith.constant dense<0.000000e+00> : vector<16xf32>
    %120 = vector.multi_reduction <add>, %119, %cst_41 [1] : vector<16x16xf32> to vector<16xf32>
    %121 = vector.shape_cast %120 : vector<16xf32> to vector<16x1xf32>
    %122 = tpu.reciprocal %121 : vector<16x1xf32> -> vector<16x1xf32>
    %123 = vector.broadcast %122 : vector<16x1xf32> to vector<16x16xf32>
    %124 = arith.mulf %119, %123 : vector<16x16xf32>
    %125 = vector.broadcast %17 : vector<1x32xf32> to vector<16x32xf32>
    %126 = arith.mulf %51, %125 : vector<16x32xf32>
    %cst_42 = arith.constant dense<0.000000e+00> : vector<16x32xf32>
    %127 = tpu.matmul %124, %126, %cst_42 {dimension_numbers = #tpu.dot_dimension_numbers<[1], [0], [0], [1], [0, 0, 1, 1], [], []>} : vector<16x16xf32>, vector<16x32xf32>, vector<16x32xf32> -> vector<16x32xf32>
    %128 = arith.addf %110, %127 : vector<16x32xf32>
    %129 = vector.broadcast %24 : vector<1x32xf32> to vector<16x32xf32>
    %130 = arith.mulf %41, %129 : vector<16x32xf32>
    %cst_43 = arith.constant dense<0.000000e+00> : vector<16x16xf32>
    %131 = tpu.matmul %130, %46, %cst_43 {dimension_numbers = #tpu.dot_dimension_numbers<[1], [1], [0], [0], [0, 0, 1, 0], [], []>} : vector<16x32xf32>, vector<16x32xf32>, vector<16x16xf32> -> vector<16x16xf32>
    %132 = arith.addf %131, %91 : vector<16x16xf32>
    %cst_44 = arith.constant dense<0xFF800000> : vector<16xf32>
    %133 = vector.multi_reduction <maximumf>, %132, %cst_44 [1] : vector<16x16xf32> to vector<16xf32>
    %134 = vector.shape_cast %133 : vector<16xf32> to vector<16x1xf32>
    %135 = vector.broadcast %134 : vector<16x1xf32> to vector<16x16xf32>
    %136 = arith.subf %132, %135 : vector<16x16xf32>
    %137 = math.exp %136 : vector<16x16xf32>
    %cst_45 = arith.constant dense<0.000000e+00> : vector<16xf32>
    %138 = vector.multi_reduction <add>, %137, %cst_45 [1] : vector<16x16xf32> to vector<16xf32>
    %139 = vector.shape_cast %138 : vector<16xf32> to vector<16x1xf32>
    %140 = tpu.reciprocal %139 : vector<16x1xf32> -> vector<16x1xf32>
    %141 = vector.broadcast %140 : vector<16x1xf32> to vector<16x16xf32>
    %142 = arith.mulf %137, %141 : vector<16x16xf32>
    %143 = vector.broadcast %24 : vector<1x32xf32> to vector<16x32xf32>
    %144 = arith.mulf %51, %143 : vector<16x32xf32>
    %cst_46 = arith.constant dense<0.000000e+00> : vector<16x32xf32>
    %145 = tpu.matmul %142, %144, %cst_46 {dimension_numbers = #tpu.dot_dimension_numbers<[1], [0], [0], [1], [0, 0, 1, 1], [], []>} : vector<16x16xf32>, vector<16x32xf32>, vector<16x32xf32> -> vector<16x32xf32>
    %146 = arith.addf %128, %145 : vector<16x32xf32>
    %147 = vector.broadcast %31 : vector<1x32xf32> to vector<16x32xf32>
    %148 = arith.mulf %41, %147 : vector<16x32xf32>
    %cst_47 = arith.constant dense<0.000000e+00> : vector<16x16xf32>
    %149 = tpu.matmul %148, %46, %cst_47 {dimension_numbers = #tpu.dot_dimension_numbers<[1], [1], [0], [0], [0, 0, 1, 0], [], []>} : vector<16x32xf32>, vector<16x32xf32>, vector<16x16xf32> -> vector<16x16xf32>
    %150 = arith.addf %149, %91 : vector<16x16xf32>
    %cst_48 = arith.constant dense<0xFF800000> : vector<16xf32>
    %151 = vector.multi_reduction <maximumf>, %150, %cst_48 [1] : vector<16x16xf32> to vector<16xf32>
    %152 = vector.shape_cast %151 : vector<16xf32> to vector<16x1xf32>
    %153 = vector.broadcast %152 : vector<16x1xf32> to vector<16x16xf32>
    %154 = arith.subf %150, %153 : vector<16x16xf32>
    %155 = math.exp %154 : vector<16x16xf32>
    %cst_49 = arith.constant dense<0.000000e+00> : vector<16xf32>
    %156 = vector.multi_reduction <add>, %155, %cst_49 [1] : vector<16x16xf32> to vector<16xf32>
    %157 = vector.shape_cast %156 : vector<16xf32> to vector<16x1xf32>
    %158 = tpu.reciprocal %157 : vector<16x1xf32> -> vector<16x1xf32>
    %159 = vector.broadcast %158 : vector<16x1xf32> to vector<16x16xf32>
    %160 = arith.mulf %155, %159 : vector<16x16xf32>
    %161 = vector.broadcast %31 : vector<1x32xf32> to vector<16x32xf32>
    %162 = arith.mulf %51, %161 : vector<16x32xf32>
    %cst_50 = arith.constant dense<0.000000e+00> : vector<16x32xf32>
    %163 = tpu.matmul %160, %162, %cst_50 {dimension_numbers = #tpu.dot_dimension_numbers<[1], [0], [0], [1], [0, 0, 1, 1], [], []>} : vector<16x16xf32>, vector<16x32xf32>, vector<16x32xf32> -> vector<16x32xf32>
    %164 = arith.addf %146, %163 : vector<16x32xf32>
    %cst_51 = arith.constant dense<0.000000e+00> : vector<16x32xf32>
    %165 = tpu.matmul %164, %52, %cst_51 {dimension_numbers = #tpu.dot_dimension_numbers<[1], [0], [0], [1], [0, 0, 1, 1], [], []>} : vector<16x32xf32>, vector<32x32xf32>, vector<16x32xf32> -> vector<16x32xf32>
    %166 = vector.broadcast %53 : vector<1x32xf32> to vector<16x32xf32>
    %167 = arith.addf %165, %166 : vector<16x32xf32>
    %c552 = arith.constant 552 : index
    %c0_52 = arith.constant 0 : index
    %168 = vector.load %arg3[%c552, %c0_52] : memref<1032x128xf32, #tpu.memory_space<vmem>>, vector<128x32xf32>
    %cst_53 = arith.constant dense<0.000000e+00> : vector<16x32xf32>
    %169 = tpu.matmul %36, %168, %cst_53 {dimension_numbers = #tpu.dot_dimension_numbers<[1], [0], [0], [1], [0, 0, 1, 1], [], []>} : vector<16x128xf32>, vector<128x32xf32>, vector<16x32xf32> -> vector<16x32xf32>
    %c680 = arith.constant 680 : index
    %c0_54 = arith.constant 0 : index
    %170 = vector.load %arg3[%c680, %c0_54] : memref<1032x128xf32, #tpu.memory_space<vmem>>, vector<32x32xf32>
    %cst_55 = arith.constant dense<0.000000e+00> : vector<16x32xf32>
    %171 = tpu.matmul %167, %170, %cst_55 {dimension_numbers = #tpu.dot_dimension_numbers<[1], [0], [0], [1], [0, 0, 1, 1], [], []>} : vector<16x32xf32>, vector<32x32xf32>, vector<16x32xf32> -> vector<16x32xf32>
    %172 = arith.addf %169, %171 : vector<16x32xf32>
    %c712 = arith.constant 712 : index
    %c0_56 = arith.constant 0 : index
    %173 = vector.load %arg3[%c712, %c0_56] : memref<1032x128xf32, #tpu.memory_space<vmem>>, vector<1x32xf32>
    %174 = vector.broadcast %173 : vector<1x32xf32> to vector<16x32xf32>
    %175 = arith.addf %172, %174 : vector<16x32xf32>
    %c720 = arith.constant 720 : index
    %c0_57 = arith.constant 0 : index
    %176 = vector.load %arg3[%c720, %c0_57] : memref<1032x128xf32, #tpu.memory_space<vmem>>, vector<128x32xf32>
    %cst_58 = arith.constant dense<0.000000e+00> : vector<16x32xf32>
    %177 = tpu.matmul %36, %176, %cst_58 {dimension_numbers = #tpu.dot_dimension_numbers<[1], [0], [0], [1], [0, 0, 1, 1], [], []>} : vector<16x128xf32>, vector<128x32xf32>, vector<16x32xf32> -> vector<16x32xf32>
    %c848 = arith.constant 848 : index
    %c0_59 = arith.constant 0 : index
    %178 = vector.load %arg3[%c848, %c0_59] : memref<1032x128xf32, #tpu.memory_space<vmem>>, vector<32x32xf32>
    %cst_60 = arith.constant dense<0.000000e+00> : vector<16x32xf32>
    %179 = tpu.matmul %167, %178, %cst_60 {dimension_numbers = #tpu.dot_dimension_numbers<[1], [0], [0], [1], [0, 0, 1, 1], [], []>} : vector<16x32xf32>, vector<32x32xf32>, vector<16x32xf32> -> vector<16x32xf32>
    %180 = arith.addf %177, %179 : vector<16x32xf32>
    %c880 = arith.constant 880 : index
    %c0_61 = arith.constant 0 : index
    %181 = vector.load %arg3[%c880, %c0_61] : memref<1032x128xf32, #tpu.memory_space<vmem>>, vector<1x32xf32>
    %182 = vector.broadcast %181 : vector<1x32xf32> to vector<16x32xf32>
    %183 = arith.addf %180, %182 : vector<16x32xf32>
    %c296 = arith.constant 296 : index
    %c0_62 = arith.constant 0 : index
    %184 = vector.load %arg3[%c296, %c0_62] : memref<1032x128xf32, #tpu.memory_space<vmem>>, vector<128x32xf32>
    %cst_63 = arith.constant dense<0.000000e+00> : vector<16x32xf32>
    %185 = tpu.matmul %36, %184, %cst_63 {dimension_numbers = #tpu.dot_dimension_numbers<[1], [0], [0], [1], [0, 0, 1, 1], [], []>} : vector<16x128xf32>, vector<128x32xf32>, vector<16x32xf32> -> vector<16x32xf32>
    %c424 = arith.constant 424 : index
    %c0_64 = arith.constant 0 : index
    %186 = vector.load %arg3[%c424, %c0_64] : memref<1032x128xf32, #tpu.memory_space<vmem>>, vector<1x32xf32>
    %187 = vector.broadcast %186 : vector<1x32xf32> to vector<16x32xf32>
    %188 = arith.addf %185, %187 : vector<16x32xf32>
    %c432 = arith.constant 432 : index
    %c0_65 = arith.constant 0 : index
    %189 = vector.load %arg3[%c432, %c0_65] : memref<1032x128xf32, #tpu.memory_space<vmem>>, vector<32x32xf32>
    %cst_66 = arith.constant dense<0.000000e+00> : vector<16x32xf32>
    %190 = tpu.matmul %175, %189, %cst_66 {dimension_numbers = #tpu.dot_dimension_numbers<[1], [0], [0], [1], [0, 0, 1, 1], [], []>} : vector<16x32xf32>, vector<32x32xf32>, vector<16x32xf32> -> vector<16x32xf32>
    %c464 = arith.constant 464 : index
    %c0_67 = arith.constant 0 : index
    %191 = vector.load %arg3[%c464, %c0_67] : memref<1032x128xf32, #tpu.memory_space<vmem>>, vector<1x32xf32>
    %192 = vector.broadcast %191 : vector<1x32xf32> to vector<16x32xf32>
    %193 = arith.addf %190, %192 : vector<16x32xf32>
    %c472 = arith.constant 472 : index
    %c0_68 = arith.constant 0 : index
    %194 = vector.load %arg3[%c472, %c0_68] : memref<1032x128xf32, #tpu.memory_space<vmem>>, vector<32x32xf32>
    %cst_69 = arith.constant dense<0.000000e+00> : vector<16x32xf32>
    %195 = tpu.matmul %183, %194, %cst_69 {dimension_numbers = #tpu.dot_dimension_numbers<[1], [0], [0], [1], [0, 0, 1, 1], [], []>} : vector<16x32xf32>, vector<32x32xf32>, vector<16x32xf32> -> vector<16x32xf32>
    %c504 = arith.constant 504 : index
    %c0_70 = arith.constant 0 : index
    %196 = vector.load %arg3[%c504, %c0_70] : memref<1032x128xf32, #tpu.memory_space<vmem>>, vector<1x32xf32>
    %197 = vector.broadcast %196 : vector<1x32xf32> to vector<16x32xf32>
    %198 = arith.addf %195, %197 : vector<16x32xf32>
    %c512 = arith.constant 512 : index
    %c0_71 = arith.constant 0 : index
    %199 = vector.load %arg3[%c512, %c0_71] : memref<1032x128xf32, #tpu.memory_space<vmem>>, vector<32x32xf32>
    %c544 = arith.constant 544 : index
    %c0_72 = arith.constant 0 : index
    %200 = vector.load %arg3[%c544, %c0_72] : memref<1032x128xf32, #tpu.memory_space<vmem>>, vector<1x32xf32>
    %201 = tpu.iota {dimensions = array<i32: 0>} : vector<16x16xi32>
    %202 = tpu.iota {dimensions = array<i32: 1>} : vector<16x16xi32>
    %c2_i32_73 = arith.constant 2 : i32
    %c0_i32_74 = arith.constant 0 : i32
    %203 = arith.cmpi eq, %c2_i32_73, %c0_i32_74 : i32
    %c1_i32_75 = arith.constant 1 : i32
    %204 = arith.select %203, %c1_i32_75, %c2_i32_73 : i32
    %205 = vector.broadcast %204 : i32 to vector<16x16xi32>
    %206 = arith.remsi %201, %205 : vector<16x16xi32>
    %c0_i32_76 = arith.constant 0 : i32
    %207 = vector.broadcast %c0_i32_76 : i32 to vector<16x16xi32>
    %208 = arith.cmpi ne, %206, %207 : vector<16x16xi32>
    %c0_i32_77 = arith.constant 0 : i32
    %209 = vector.broadcast %c0_i32_77 : i32 to vector<16x16xi32>
    %210 = arith.cmpi slt, %206, %209 : vector<16x16xi32>
    %c0_i32_78 = arith.constant 0 : i32
    %211 = arith.cmpi slt, %204, %c0_i32_78 : i32
    %212 = vector.broadcast %211 : i1 to vector<16x16xi1>
    %213 = vector.broadcast %212 : vector<16x16xi1> to vector<16x16xi1>
    %214 = arith.xori %210, %213 : vector<16x16xi1>
    %215 = arith.andi %214, %208 : vector<16x16xi1>
    %216 = vector.broadcast %204 : i32 to vector<16x16xi32>
    %217 = arith.addi %206, %216 : vector<16x16xi32>
    %218 = arith.select %215, %217, %206 : vector<16x16xi1>, vector<16x16xi32>
    %c2_i32_79 = arith.constant 2 : i32
    %c0_i32_80 = arith.constant 0 : i32
    %219 = arith.cmpi eq, %c2_i32_79, %c0_i32_80 : i32
    %c1_i32_81 = arith.constant 1 : i32
    %220 = arith.select %219, %c1_i32_81, %c2_i32_79 : i32
    %221 = vector.broadcast %220 : i32 to vector<16x16xi32>
    %222 = arith.remsi %202, %221 : vector<16x16xi32>
    %c0_i32_82 = arith.constant 0 : i32
    %223 = vector.broadcast %c0_i32_82 : i32 to vector<16x16xi32>
    %224 = arith.cmpi ne, %222, %223 : vector<16x16xi32>
    %c0_i32_83 = arith.constant 0 : i32
    %225 = vector.broadcast %c0_i32_83 : i32 to vector<16x16xi32>
    %226 = arith.cmpi slt, %222, %225 : vector<16x16xi32>
    %c0_i32_84 = arith.constant 0 : i32
    %227 = arith.cmpi slt, %220, %c0_i32_84 : i32
    %228 = vector.broadcast %227 : i1 to vector<16x16xi1>
    %229 = vector.broadcast %228 : vector<16x16xi1> to vector<16x16xi1>
    %230 = arith.xori %226, %229 : vector<16x16xi1>
    %231 = arith.andi %230, %224 : vector<16x16xi1>
    %232 = vector.broadcast %220 : i32 to vector<16x16xi32>
    %233 = arith.addi %222, %232 : vector<16x16xi32>
    %234 = arith.select %231, %233, %222 : vector<16x16xi1>, vector<16x16xi32>
    %235 = arith.cmpi eq, %218, %234 : vector<16x16xi32>
    %cst_85 = arith.constant 0.000000e+00 : f32
    %cst_86 = arith.constant -1.000000e+30 : f32
    %236 = vector.broadcast %cst_85 : f32 to vector<16x16xf32>
    %237 = vector.broadcast %cst_86 : f32 to vector<16x16xf32>
    %238 = arith.select %235, %236, %237 : vector<16x16xi1>, vector<16x16xf32>
    %cst_87 = arith.constant 0.000000e+00 : f32
    %239 = vector.broadcast %cst_87 : f32 to vector<16x32xf32>
    %240 = vector.broadcast %10 : vector<1x32xf32> to vector<16x32xf32>
    %241 = arith.mulf %188, %240 : vector<16x32xf32>
    %cst_88 = arith.constant dense<0.000000e+00> : vector<16x16xf32>
    %242 = tpu.matmul %241, %193, %cst_88 {dimension_numbers = #tpu.dot_dimension_numbers<[1], [1], [0], [0], [0, 0, 1, 0], [], []>} : vector<16x32xf32>, vector<16x32xf32>, vector<16x16xf32> -> vector<16x16xf32>
    %243 = arith.addf %242, %238 : vector<16x16xf32>
    %cst_89 = arith.constant dense<0xFF800000> : vector<16xf32>
    %244 = vector.multi_reduction <maximumf>, %243, %cst_89 [1] : vector<16x16xf32> to vector<16xf32>
    %245 = vector.shape_cast %244 : vector<16xf32> to vector<16x1xf32>
    %246 = vector.broadcast %245 : vector<16x1xf32> to vector<16x16xf32>
    %247 = arith.subf %243, %246 : vector<16x16xf32>
    %248 = math.exp %247 : vector<16x16xf32>
    %cst_90 = arith.constant dense<0.000000e+00> : vector<16xf32>
    %249 = vector.multi_reduction <add>, %248, %cst_90 [1] : vector<16x16xf32> to vector<16xf32>
    %250 = vector.shape_cast %249 : vector<16xf32> to vector<16x1xf32>
    %251 = tpu.reciprocal %250 : vector<16x1xf32> -> vector<16x1xf32>
    %252 = vector.broadcast %251 : vector<16x1xf32> to vector<16x16xf32>
    %253 = arith.mulf %248, %252 : vector<16x16xf32>
    %254 = vector.broadcast %10 : vector<1x32xf32> to vector<16x32xf32>
    %255 = arith.mulf %198, %254 : vector<16x32xf32>
    %cst_91 = arith.constant dense<0.000000e+00> : vector<16x32xf32>
    %256 = tpu.matmul %253, %255, %cst_91 {dimension_numbers = #tpu.dot_dimension_numbers<[1], [0], [0], [1], [0, 0, 1, 1], [], []>} : vector<16x16xf32>, vector<16x32xf32>, vector<16x32xf32> -> vector<16x32xf32>
    %257 = arith.addf %239, %256 : vector<16x32xf32>
    %258 = vector.broadcast %17 : vector<1x32xf32> to vector<16x32xf32>
    %259 = arith.mulf %188, %258 : vector<16x32xf32>
    %cst_92 = arith.constant dense<0.000000e+00> : vector<16x16xf32>
    %260 = tpu.matmul %259, %193, %cst_92 {dimension_numbers = #tpu.dot_dimension_numbers<[1], [1], [0], [0], [0, 0, 1, 0], [], []>} : vector<16x32xf32>, vector<16x32xf32>, vector<16x16xf32> -> vector<16x16xf32>
    %261 = arith.addf %260, %238 : vector<16x16xf32>
    %cst_93 = arith.constant dense<0xFF800000> : vector<16xf32>
    %262 = vector.multi_reduction <maximumf>, %261, %cst_93 [1] : vector<16x16xf32> to vector<16xf32>
    %263 = vector.shape_cast %262 : vector<16xf32> to vector<16x1xf32>
    %264 = vector.broadcast %263 : vector<16x1xf32> to vector<16x16xf32>
    %265 = arith.subf %261, %264 : vector<16x16xf32>
    %266 = math.exp %265 : vector<16x16xf32>
    %cst_94 = arith.constant dense<0.000000e+00> : vector<16xf32>
    %267 = vector.multi_reduction <add>, %266, %cst_94 [1] : vector<16x16xf32> to vector<16xf32>
    %268 = vector.shape_cast %267 : vector<16xf32> to vector<16x1xf32>
    %269 = tpu.reciprocal %268 : vector<16x1xf32> -> vector<16x1xf32>
    %270 = vector.broadcast %269 : vector<16x1xf32> to vector<16x16xf32>
    %271 = arith.mulf %266, %270 : vector<16x16xf32>
    %272 = vector.broadcast %17 : vector<1x32xf32> to vector<16x32xf32>
    %273 = arith.mulf %198, %272 : vector<16x32xf32>
    %cst_95 = arith.constant dense<0.000000e+00> : vector<16x32xf32>
    %274 = tpu.matmul %271, %273, %cst_95 {dimension_numbers = #tpu.dot_dimension_numbers<[1], [0], [0], [1], [0, 0, 1, 1], [], []>} : vector<16x16xf32>, vector<16x32xf32>, vector<16x32xf32> -> vector<16x32xf32>
    %275 = arith.addf %257, %274 : vector<16x32xf32>
    %276 = vector.broadcast %24 : vector<1x32xf32> to vector<16x32xf32>
    %277 = arith.mulf %188, %276 : vector<16x32xf32>
    %cst_96 = arith.constant dense<0.000000e+00> : vector<16x16xf32>
    %278 = tpu.matmul %277, %193, %cst_96 {dimension_numbers = #tpu.dot_dimension_numbers<[1], [1], [0], [0], [0, 0, 1, 0], [], []>} : vector<16x32xf32>, vector<16x32xf32>, vector<16x16xf32> -> vector<16x16xf32>
    %279 = arith.addf %278, %238 : vector<16x16xf32>
    %cst_97 = arith.constant dense<0xFF800000> : vector<16xf32>
    %280 = vector.multi_reduction <maximumf>, %279, %cst_97 [1] : vector<16x16xf32> to vector<16xf32>
    %281 = vector.shape_cast %280 : vector<16xf32> to vector<16x1xf32>
    %282 = vector.broadcast %281 : vector<16x1xf32> to vector<16x16xf32>
    %283 = arith.subf %279, %282 : vector<16x16xf32>
    %284 = math.exp %283 : vector<16x16xf32>
    %cst_98 = arith.constant dense<0.000000e+00> : vector<16xf32>
    %285 = vector.multi_reduction <add>, %284, %cst_98 [1] : vector<16x16xf32> to vector<16xf32>
    %286 = vector.shape_cast %285 : vector<16xf32> to vector<16x1xf32>
    %287 = tpu.reciprocal %286 : vector<16x1xf32> -> vector<16x1xf32>
    %288 = vector.broadcast %287 : vector<16x1xf32> to vector<16x16xf32>
    %289 = arith.mulf %284, %288 : vector<16x16xf32>
    %290 = vector.broadcast %24 : vector<1x32xf32> to vector<16x32xf32>
    %291 = arith.mulf %198, %290 : vector<16x32xf32>
    %cst_99 = arith.constant dense<0.000000e+00> : vector<16x32xf32>
    %292 = tpu.matmul %289, %291, %cst_99 {dimension_numbers = #tpu.dot_dimension_numbers<[1], [0], [0], [1], [0, 0, 1, 1], [], []>} : vector<16x16xf32>, vector<16x32xf32>, vector<16x32xf32> -> vector<16x32xf32>
    %293 = arith.addf %275, %292 : vector<16x32xf32>
    %294 = vector.broadcast %31 : vector<1x32xf32> to vector<16x32xf32>
    %295 = arith.mulf %188, %294 : vector<16x32xf32>
    %cst_100 = arith.constant dense<0.000000e+00> : vector<16x16xf32>
    %296 = tpu.matmul %295, %193, %cst_100 {dimension_numbers = #tpu.dot_dimension_numbers<[1], [1], [0], [0], [0, 0, 1, 0], [], []>} : vector<16x32xf32>, vector<16x32xf32>, vector<16x16xf32> -> vector<16x16xf32>
    %297 = arith.addf %296, %238 : vector<16x16xf32>
    %cst_101 = arith.constant dense<0xFF800000> : vector<16xf32>
    %298 = vector.multi_reduction <maximumf>, %297, %cst_101 [1] : vector<16x16xf32> to vector<16xf32>
    %299 = vector.shape_cast %298 : vector<16xf32> to vector<16x1xf32>
    %300 = vector.broadcast %299 : vector<16x1xf32> to vector<16x16xf32>
    %301 = arith.subf %297, %300 : vector<16x16xf32>
    %302 = math.exp %301 : vector<16x16xf32>
    %cst_102 = arith.constant dense<0.000000e+00> : vector<16xf32>
    %303 = vector.multi_reduction <add>, %302, %cst_102 [1] : vector<16x16xf32> to vector<16xf32>
    %304 = vector.shape_cast %303 : vector<16xf32> to vector<16x1xf32>
    %305 = tpu.reciprocal %304 : vector<16x1xf32> -> vector<16x1xf32>
    %306 = vector.broadcast %305 : vector<16x1xf32> to vector<16x16xf32>
    %307 = arith.mulf %302, %306 : vector<16x16xf32>
    %308 = vector.broadcast %31 : vector<1x32xf32> to vector<16x32xf32>
    %309 = arith.mulf %198, %308 : vector<16x32xf32>
    %cst_103 = arith.constant dense<0.000000e+00> : vector<16x32xf32>
    %310 = tpu.matmul %307, %309, %cst_103 {dimension_numbers = #tpu.dot_dimension_numbers<[1], [0], [0], [1], [0, 0, 1, 1], [], []>} : vector<16x16xf32>, vector<16x32xf32>, vector<16x32xf32> -> vector<16x32xf32>
    %311 = arith.addf %293, %310 : vector<16x32xf32>
    %cst_104 = arith.constant dense<0.000000e+00> : vector<16x32xf32>
    %312 = tpu.matmul %311, %199, %cst_104 {dimension_numbers = #tpu.dot_dimension_numbers<[1], [0], [0], [1], [0, 0, 1, 1], [], []>} : vector<16x32xf32>, vector<32x32xf32>, vector<16x32xf32> -> vector<16x32xf32>
    %313 = vector.broadcast %200 : vector<1x32xf32> to vector<16x32xf32>
    %314 = arith.addf %312, %313 : vector<16x32xf32>
    %315 = vector.extract_strided_slice %36 {offsets = [0, 0], sizes = [16, 32], strides = [1, 1]} : vector<16x128xf32> to vector<16x32xf32>
    %316 = arith.addf %314, %315 : vector<16x32xf32>
    %317 = arith.addf %316, %175 : vector<16x32xf32>
    %318 = arith.addf %317, %183 : vector<16x32xf32>
    %c888 = arith.constant 888 : index
    %c0_105 = arith.constant 0 : index
    %319 = vector.load %arg3[%c888, %c0_105] : memref<1032x128xf32, #tpu.memory_space<vmem>>, vector<1x32xf32>
    %c896 = arith.constant 896 : index
    %c0_106 = arith.constant 0 : index
    %320 = vector.load %arg3[%c896, %c0_106] : memref<1032x128xf32, #tpu.memory_space<vmem>>, vector<1x32xf32>
    %cst_107 = arith.constant dense<0.000000e+00> : vector<16xf32>
    %321 = vector.multi_reduction <add>, %318, %cst_107 [1] : vector<16x32xf32> to vector<16xf32>
    %322 = vector.shape_cast %321 : vector<16xf32> to vector<16x1xf32>
    %cst_108 = arith.constant 3.200000e+01 : f32
    %323 = vector.broadcast %cst_108 : f32 to vector<16x1xf32>
    %324 = arith.divf %322, %323 : vector<16x1xf32>
    %325 = vector.broadcast %324 : vector<16x1xf32> to vector<16x32xf32>
    %326 = arith.subf %318, %325 : vector<16x32xf32>
    %327 = arith.mulf %326, %326 : vector<16x32xf32>
    %cst_109 = arith.constant dense<0.000000e+00> : vector<16xf32>
    %328 = vector.multi_reduction <add>, %327, %cst_109 [1] : vector<16x32xf32> to vector<16xf32>
    %329 = vector.shape_cast %328 : vector<16xf32> to vector<16x1xf32>
    %cst_110 = arith.constant 3.200000e+01 : f32
    %330 = vector.broadcast %cst_110 : f32 to vector<16x1xf32>
    %331 = arith.divf %329, %330 : vector<16x1xf32>
    %332 = vector.broadcast %324 : vector<16x1xf32> to vector<16x32xf32>
    %333 = arith.subf %318, %332 : vector<16x32xf32>
    %cst_111 = arith.constant 9.99999996E-13 : f32
    %334 = vector.broadcast %cst_111 : f32 to vector<16x1xf32>
    %335 = arith.addf %331, %334 : vector<16x1xf32>
    %336 = math.rsqrt %335 : vector<16x1xf32>
    %337 = vector.broadcast %336 : vector<16x1xf32> to vector<16x32xf32>
    %338 = arith.mulf %333, %337 : vector<16x32xf32>
    %339 = vector.broadcast %319 : vector<1x32xf32> to vector<16x32xf32>
    %340 = arith.mulf %338, %339 : vector<16x32xf32>
    %341 = vector.broadcast %320 : vector<1x32xf32> to vector<16x32xf32>
    %342 = arith.addf %340, %341 : vector<16x32xf32>
    %c904 = arith.constant 904 : index
    %c0_112 = arith.constant 0 : index
    %343 = vector.load %arg3[%c904, %c0_112] : memref<1032x128xf32, #tpu.memory_space<vmem>>, vector<32x64xf32>
    %cst_113 = arith.constant dense<0.000000e+00> : vector<16x64xf32>
    %344 = tpu.matmul %342, %343, %cst_113 {dimension_numbers = #tpu.dot_dimension_numbers<[1], [0], [0], [1], [0, 0, 1, 1], [], []>} : vector<16x32xf32>, vector<32x64xf32>, vector<16x64xf32> -> vector<16x64xf32>
    %c936 = arith.constant 936 : index
    %c0_114 = arith.constant 0 : index
    %345 = vector.load %arg3[%c936, %c0_114] : memref<1032x128xf32, #tpu.memory_space<vmem>>, vector<1x64xf32>
    %346 = vector.broadcast %345 : vector<1x64xf32> to vector<16x64xf32>
    %347 = arith.addf %344, %346 : vector<16x64xf32>
    %cst_115 = arith.constant 0.000000e+00 : f32
    %348 = vector.broadcast %cst_115 : f32 to vector<16x64xf32>
    %349 = arith.maximumf %347, %348 : vector<16x64xf32>
    %c944 = arith.constant 944 : index
    %c0_116 = arith.constant 0 : index
    %350 = vector.load %arg3[%c944, %c0_116] : memref<1032x128xf32, #tpu.memory_space<vmem>>, vector<64x32xf32>
    %cst_117 = arith.constant dense<0.000000e+00> : vector<16x32xf32>
    %351 = tpu.matmul %349, %350, %cst_117 {dimension_numbers = #tpu.dot_dimension_numbers<[1], [0], [0], [1], [0, 0, 1, 1], [], []>} : vector<16x64xf32>, vector<64x32xf32>, vector<16x32xf32> -> vector<16x32xf32>
    %c1008 = arith.constant 1008 : index
    %c0_118 = arith.constant 0 : index
    %352 = vector.load %arg3[%c1008, %c0_118] : memref<1032x128xf32, #tpu.memory_space<vmem>>, vector<1x32xf32>
    %353 = vector.broadcast %352 : vector<1x32xf32> to vector<16x32xf32>
    %354 = arith.addf %351, %353 : vector<16x32xf32>
    %355 = arith.addf %354, %342 : vector<16x32xf32>
    %c1016 = arith.constant 1016 : index
    %c0_119 = arith.constant 0 : index
    %356 = vector.load %arg3[%c1016, %c0_119] : memref<1032x128xf32, #tpu.memory_space<vmem>>, vector<1x32xf32>
    %c1024 = arith.constant 1024 : index
    %c0_120 = arith.constant 0 : index
    %357 = vector.load %arg3[%c1024, %c0_120] : memref<1032x128xf32, #tpu.memory_space<vmem>>, vector<1x32xf32>
    %cst_121 = arith.constant dense<0.000000e+00> : vector<16xf32>
    %358 = vector.multi_reduction <add>, %355, %cst_121 [1] : vector<16x32xf32> to vector<16xf32>
    %359 = vector.shape_cast %358 : vector<16xf32> to vector<16x1xf32>
    %cst_122 = arith.constant 3.200000e+01 : f32
    %360 = vector.broadcast %cst_122 : f32 to vector<16x1xf32>
    %361 = arith.divf %359, %360 : vector<16x1xf32>
    %362 = vector.broadcast %361 : vector<16x1xf32> to vector<16x32xf32>
    %363 = arith.subf %355, %362 : vector<16x32xf32>
    %364 = arith.mulf %363, %363 : vector<16x32xf32>
    %cst_123 = arith.constant dense<0.000000e+00> : vector<16xf32>
    %365 = vector.multi_reduction <add>, %364, %cst_123 [1] : vector<16x32xf32> to vector<16xf32>
    %366 = vector.shape_cast %365 : vector<16xf32> to vector<16x1xf32>
    %cst_124 = arith.constant 3.200000e+01 : f32
    %367 = vector.broadcast %cst_124 : f32 to vector<16x1xf32>
    %368 = arith.divf %366, %367 : vector<16x1xf32>
    %369 = vector.broadcast %361 : vector<16x1xf32> to vector<16x32xf32>
    %370 = arith.subf %355, %369 : vector<16x32xf32>
    %cst_125 = arith.constant 9.99999996E-13 : f32
    %371 = vector.broadcast %cst_125 : f32 to vector<16x1xf32>
    %372 = arith.addf %368, %371 : vector<16x1xf32>
    %373 = math.rsqrt %372 : vector<16x1xf32>
    %374 = vector.broadcast %373 : vector<16x1xf32> to vector<16x32xf32>
    %375 = arith.mulf %370, %374 : vector<16x32xf32>
    %376 = vector.broadcast %356 : vector<1x32xf32> to vector<16x32xf32>
    %377 = arith.mulf %375, %376 : vector<16x32xf32>
    %378 = vector.broadcast %357 : vector<1x32xf32> to vector<16x32xf32>
    %379 = arith.addf %377, %378 : vector<16x32xf32>
    %c0_126 = arith.constant 0 : index
    %c0_127 = arith.constant 0 : index
    %380 = vector.load %arg4[%c0_126, %c0_127] : memref<16x128xf32, #tpu.memory_space<vmem>>, vector<16x128xf32>
    tpu.vector_store %arg4[%c0_126, %c0_127], %36 {strides = array<i32>} : memref<16x128xf32, #tpu.memory_space<vmem>>, vector<16x128xf32>,
    %c0_128 = arith.constant 0 : index
    %c0_129 = arith.constant 0 : index
    %381 = vector.load %arg4[%c0_128, %c0_129] : memref<16x128xf32, #tpu.memory_space<vmem>>, vector<16x32xf32>
    tpu.vector_store %arg4[%c0_128, %c0_129], %379 {strides = array<i32>} : memref<16x128xf32, #tpu.memory_space<vmem>>, vector<16x32xf32>,
    return
  }
}

</mosaic_0001>

<bundles_post_ra>
// kernel: forward.1
= control target key start
LH: loop header
LB: loop body
LE: loop exit
PB: predicated region body
PF: predicated region fallthrough
CT: control target
= control target key end

     0   :  { %9 = vsyncpa [#allocation3], 0  ;;  %s4666_s0 = inlined_call_operand.hbm [shape: f32[16,32], index: 0, kind: input, shape index: {}]   ;;  %s4667_s1 = inlined_call_operand.vmem [shape: f32[16,32], index: 1, kind: input, shape index: {}]   ;;  %s4668_s2 = inlined_call_operand.hbm [shape: f32[16,32], index: 2, kind: input, shape index: {}]   ;;  %s4669_s3 = inlined_call_operand.hbm [shape: f32[1032,128], index: 3, kind: input, shape index: {}]   ;;  %s4670_s4 = inlined_call_operand.vmem [shape: f32[16,128], index: 4, kind: output, shape index: {}]  }
   0x1   :  { %10 = vsyncpa [#allocation5], 0  ;;  %s4272_s15 = smov [#allocation4]   ;;  %s4273_s17 = smov [#allocation2]  }
   0x2   :  { %s30_s16 = sshll.u32 %s4272_s15, 4  ;;  %s16_s18 = sshll.u32 %s4273_s17, 4  ;;  %s31_s16 = int_to_ptr.vmem [resolvable:$true] %s30_s16  ;;  %s4304_s18 = int_to_ptr.vmem [resolvable:$true] %s16_s18 }
   0x3   :  { %s4202_s21 = scalar_lea.hbm %s4668_s2, 256 }
   0x4   :  { %p4203_p0 = scmp.ne.s32.totalorder %s4668_s2, %s4202_s21  ;;  %p4206_p1 = scmp.lt.u32.totalorder %s4202_s21, %s4668_s2 }
   0x6   :  { %p4208_p2 = pnand %p4206_p1, %p4203_p0 }
   0x8   :  { %4211 = shalt.err (!%p4208_p2)
}
   0x9   :  { %s4212_s26 = scalar_lea.vmem %s31_s16, 256  ;;  %p4217_p4 = scmp.lt.s32.totalorder %s31_s16, %s31_s16 }
   0xa   :  { %p4213_p3 = scmp.ne.s32.totalorder %s31_s16, %s4212_s26  ;;  %p4218_p5 = scmp.lt.s32.totalorder %s4212_s26, %s4212_s26 }
   0xc   :  { %p4219_p6 = por %p4218_p5, %p4217_p4 }
   0xe   :  { %p4220_p7 = pnand %p4219_p6, %p4213_p3 }
  0x10   :  { %4223 = shalt.err (!%p4220_p7)
}
  0x11   :  { %s4274_s27 = smov 128   ;;  %s4275_s28 = smov 8  }
  0x12   :  { %36 = dma.hbm_to_vmem [thread:$0]  %s4668_s2, 256, %s31_s16, [#allocation5], %s4274_s27, %s4274_s27, %s4275_s28  }
  0x13   :  { %s4224_s7 = scalar_lea.hbm %s4666_s0, 256 }
  0x14   :  { %p4225_p8 = scmp.ne.s32.totalorder %s4666_s0, %s4224_s7  ;;  %p4228_p9 = scmp.lt.u32.totalorder %s4224_s7, %s4666_s0 }
  0x16   :  { %p4230_p10 = pnand %p4228_p9, %p4225_p8 }
  0x18   :  { %4233 = shalt.err (!%p4230_p10)
}
  0x19   :  { %s4234_s12 = scalar_lea.vmem %s4304_s18, 256  ;;  %p4239_p12 = scmp.lt.s32.totalorder %s4304_s18, %s4304_s18 }
  0x1a   :  { %p4235_p11 = scmp.ne.s32.totalorder %s4304_s18, %s4234_s12  ;;  %p4240_p13 = scmp.lt.s32.totalorder %s4234_s12, %s4234_s12 }
  0x1c   :  { %p4241_p0 = por %p4240_p13, %p4239_p12 }
  0x1e   :  { %p4242_p1 = pnand %p4241_p0, %p4235_p11 }
  0x20   :  { %4245 = shalt.err (!%p4242_p1)
}
  0x21   :  { %22 = dma.hbm_to_vmem [thread:$0]  %s4666_s0, 256, %s4304_s18, [#allocation3], %s4274_s27, %s4274_s27, %s4275_s28  }
  0x22   :  { %s4276_s14 = smov [#allocation6]   ;;  %s4246_s19 = scalar_lea.hbm %s4669_s3, 16512 }
  0x23   :  { %s42_s15 = sshll.u32 %s4276_s14, 4  ;;  %p4247_p2 = scmp.ne.s32.totalorder %s4669_s3, %s4246_s19  ;;  %s43_s15 = int_to_ptr.vmem [resolvable:$true] %s42_s15 }
  0x24   :  { %p4250_p3 = scmp.lt.u32.totalorder %s4246_s19, %s4669_s3 }
  0x26   :  { %p4252_p4 = pnand %p4250_p3, %p4247_p2 }
  0x28   :  { %4255 = shalt.err (!%p4252_p4)
}
  0x29   :  { %s4256_s24 = scalar_lea.vmem %s43_s15, 16512  ;;  %p4261_p6 = scmp.lt.s32.totalorder %s43_s15, %s43_s15 }
  0x2a   :  { %p4257_p5 = scmp.ne.s32.totalorder %s43_s15, %s4256_s24  ;;  %p4262_p7 = scmp.lt.s32.totalorder %s4256_s24, %s4256_s24 }
  0x2c   :  { %p4263_p8 = por %p4262_p7, %p4261_p6 }
  0x2e   :  { %p4264_p9 = pnand %p4263_p8, %p4257_p5 }
  0x30   :  { %4267 = shalt.err (!%p4264_p9)
}
  0x31   :  { %48 = dma.hbm_to_vmem [thread:$0]  %s4669_s3, 16512, %s43_s15, [#allocation5], %s4274_s27, %s4274_s27, %s4275_s28  }
  0x32   :  { %4268 = dma.done.wait [#allocation3], 256  }
  0x33   :  { %4269 = vsyncadd [#allocation3], 4294967040 }
  0x34   :  { %4270 = dma.done.wait [#allocation5], 16768  }
  0x35   :  { %4271 = vsyncadd [#allocation5], 4294950528  ;;  %vm95_vm0 = vcmask 261120   ;;  %v86_v0 = vld [vmem:[#allocation6] sm:$0xff]  ;;  %v87_v1 = vld [vmem:[#allocation6 + $0x8] sm:$0xff]  ;;  %v64_v60 = vlaneseq  ;;  %vm590_vm11 = vcmask 130048  }
  0x36   :  { %v88_v2 = vld [vmem:[#allocation6 + $0x10] sm:$0xff]  ;;  %v3801_v3 = vpack.c.bf16 %v87_v1, %v86_v0  ;;  %v89_v4 = vld [vmem:[#allocation6 + $0x18] sm:$0xff]  ;;  %v58_v5 = vld [vmem:[#allocation2] sm:$0xff]  ;;  %vm2989_vm15 = vcmask 523264  }
  0x37   :  { %v3805_v6 = vpack.c.bf16 %v89_v4, %v88_v2  ;;  %3428 = vmatprep.mubr.msk.f32.mxu1 %vm95_vm0, %v58_v5  ;;  %v177_v7 = vld [vmem:[#allocation6 + $0x28] sm:$0xff]  ;;  %v178_v8 = vld [vmem:[#allocation6 + $0x30] sm:$0xff]  ;;  %v179_v11 = vld [vmem:[#allocation6 + $0x38] sm:$0xff]  ;;  %v4399_v61 = vand.u32 127, %v64_v60  ;;  %v4277_v2 = vmov 0.0  }
  0x38   :  { %3802 = vmatprep.subr.bf16.mxu1 %v3801_v3  ;;  %v273_v9 = vld [vmem:[#allocation6 + $0xb0] sm:$0xff]  ;;  %v3809_v10 = vpack.c.bf16 %v178_v8, %v177_v7  ;;  %v274_v12 = vld [vmem:[#allocation6 + $0xb8] sm:$0xff]  ;;  %v180_v13 = vld [vmem:[#allocation6 + $0x40] sm:$0xff] }
  0x39   :  { %3804 = vmatpush3.bf16.msra.mxu1 %v3801_v3  ;;  %v3841_v14 = vpack.c.bf16 %v274_v12, %v273_v9  ;;  %v275_v15 = vld [vmem:[#allocation6 + $0xc0] sm:$0xff]  ;;  %v276_v16 = vld [vmem:[#allocation6 + $0xc8] sm:$0xff]  ;;  %v3813_v20 = vpack.c.bf16 %v180_v13, %v179_v11  ;;  %v182_v22 = vld [vmem:[#allocation6 + $0x50] sm:$0xff]  ;;  %vm71_vm2 = vcmp.ge.s32.totalorder %v4399_v61, 8  ;;  %vm72_vm3 = vcmp.lt.s32.totalorder %v4399_v61, 16 }
  0x3a   :  { %3806 = vmatprep.subr.bf16.mxu1 %v3805_v6  ;;  %v3845_v17 = vpack.c.bf16 %v276_v16, %v275_v15  ;;  %v60_v18 = vld [vmem:[%s4667_s1] sm:$0xff]  ;;  %v59_v19 = vld [vmem:[#allocation2 + $0x8] sm:$0xff]  ;;  %v183_v25 = vld [vmem:[#allocation6 + $0x58] sm:$0xff]  ;;  %vm67_vm4 = vcmp.lt.s32.totalorder %v4399_v61, 8  ;;  %vm76_vm6 = vcmp.ge.s32.totalorder %v4399_v61, 16  ;;  %vm77_vm7 = vcmp.lt.s32.totalorder %v4399_v61, 24 }
  0x3b   :  { %3842 = vmatprep.subr.bf16.mxu0 %v3841_v14  ;;  %v181_v21 = vld [vmem:[#allocation6 + $0x48] sm:$0xff]  ;;  %3474 = vmatprep.mubr.msk.f32.mxu0 %vm95_vm0, %v60_v18  ;;  %v184_v26 = vld [vmem:[#allocation6 + $0x60] sm:$0xff]  ;;  %v186_v29 = vld [vmem:[#allocation6 + $0x70] sm:$0xff]  ;;  %v4407_v3 = vsel %vm67_vm4, 1.0, %v4277_v2  ;;  %vm81_vm12 = vcmp.ge.s32.totalorder %v4399_v61, 24  ;;  %vm82_vm13 = vcmp.lt.s32.totalorder %v4399_v61, 32 }
  0x3c   :  { %3844 = vmatpush3.bf16.msra.mxu0 %v3841_v14  ;;  %v3817_v23 = vpack.c.bf16 %v182_v22, %v181_v21  ;;  %v61_v24 = vld [vmem:[%s4667_s1 + $0x8] sm:$0xff]  ;;  %v3821_v27 = vpack.c.bf16 %v184_v26, %v183_v25  ;;  %v187_v31 = vld [vmem:[#allocation6 + $0x78] sm:$0xff]  ;;  %v188_v32 = vld [vmem:[#allocation6 + $0x80] sm:$0xff]  ;;  %v489_v26 = vand.u32 1, %v4399_v61 }
  0x3d   :  { %3808 = vmatpush3.bf16.msra.mxu1 %v3805_v6  ;;  %3846 = vmatprep.subr.bf16.mxu0 %v3845_v17  ;;  %v185_v28 = vld [vmem:[#allocation6 + $0x68] sm:$0xff]  ;;  %v3829_v33 = vpack.c.bf16 %v188_v32, %v187_v31  ;;  %v190_v35 = vld [vmem:[#allocation6 + $0x90] sm:$0xff]  ;;  %v191_v37 = vld [vmem:[#allocation6 + $0x98] sm:$0xff] }
  0x3e   :  { %3810 = vmatprep.subr.bf16.mxu1 %v3809_v10  ;;  %v3825_v30 = vpack.c.bf16 %v186_v29, %v185_v28  ;;  %v189_v34 = vld [vmem:[#allocation6 + $0x88] sm:$0xff]  ;;  %v192_v38 = vld [vmem:[#allocation6 + $0xa0] sm:$0xff]  ;;  %v363_v40 = vld [vmem:[#allocation6 + $0xd8] sm:$0xff]  ;;  %v4278_v29 = vmov -1e+30  }
  0x3f   :  { %v3833_v36 = vpack.c.bf16 %v190_v35, %v189_v34  ;;  %v3837_v39 = vpack.c.bf16 %v192_v38, %v191_v37  ;;  %v364_v41 = vld [vmem:[#allocation6 + $0xe0] sm:$0xff]  ;;  %v365_v42 = vld [vmem:[#allocation6 + $0xe8] sm:$0xff]  ;;  %v366_v44 = vld [vmem:[#allocation6 + $0xf0] sm:$0xff] }
  0x40   :  { %3429 = vmatmul.mubr.msk.f32.vlgmr.msra.gmra.mrb[0].mxu1 %vm95_vm0, %v59_v19  ;;  %3848 = vmatpush3.bf16.msra.mxu0 %v3845_v17  ;;  %v3849_v43 = vpack.c.bf16 %v364_v41, %v363_v40  ;;  %v3853_v45 = vpack.c.bf16 %v366_v44, %v365_v42  ;;  %v62_v46 = vld [vmem:[#allocation4] sm:$0xff]  ;;  %v63_v47 = vld [vmem:[#allocation4 + $0x8] sm:$0xff]  ;;  %v3127_v48 = vld [vmem:[#allocation6 + $0x20] ss:$0 sm:$0xff] }
  0x41   :  { %3812 = vmatpush3.bf16.msra.mxu1 %v3809_v10  ;;  %v3131_v53 = vld [vmem:[#allocation6 + $0xd0] ss:$0 sm:$0xff]  ;;  %vm4384_vm1 = vmpackc.low %vm95_vm0, %vm95_vm0  ;;  %v3134_v63 = vld [vmem:[#allocation6 + $0xf8] ss:$0 sm:$0xff] }
  0x42   :  { %3814 = vmatprep.subr.bf16.mxu1 %v3813_v20  ;;  %3850 = vmatprep.subr.bf16.mxu0 %v3849_v43  ;;  %vm73_vm5 = vmand %vm71_vm2, %vm72_vm3  ;;  %v3130_v12 = vld [vmem:[#allocation6 + $0xa8] ss:$0 sm:$0xff] }
  0x43   :  { %3475 = vmatmul.mubr.msk.f32.vlgmr.msra.gmra.mrb[0].mxu0 %vm95_vm0, %v61_v24  ;;  %v4410_v4 = vsel %vm73_vm5, 1.0, %v4277_v2  ;;  %vm78_vm8 = vmand %vm76_vm6, %vm77_vm7  ;;  %v459_v24 = vshrl.u32 %v64_v60, 7 }
  0x44   :  { %3852 = vmatpush3.bf16.msra.mxu0 %v3849_v43  ;;  %3485 = vmatprep.mubr.msk.f32.mxu0 %vm95_vm0, %v62_v46  ;;  %vm83_vm14 = vmand %vm81_vm12, %vm82_vm13 }
  0x45   :  { %3816 = vmatpush3.bf16.msra.mxu1 %v3813_v20  ;;  %3854 = vmatprep.subr.bf16.mxu0 %v3853_v45  ;;  %v4447_v20 = vsel %vm78_vm8, 1.0, %v4277_v2  ;;  %v460_v25 = vadd.s32 8, %v459_v24 }
  0x46   :  { %3818 = vmatprep.subr.bf16.mxu1 %v3817_v23 }
  0x47   :  { %v472_v28 = vand.u32 1, %v460_v25 }
  0x48   :  { %3856 = vmatpush3.bf16.msra.mxu0 %v3853_v45 }
  0x49   :  { %3820 = vmatpush3.bf16.msra.mxu1 %v3817_v23  ;;  %vm498_vm10 = vcmp.eq.s32.totalorder %v472_v28, %v489_v26 }
  0x4a   :  { %3822 = vmatprep.subr.bf16.mxu1 %v3821_v27  ;;  %v4464_v32 = vsel %vm498_vm10, 0.0, %v4278_v29 }
  0x4b   :  { %3486 = vmatmul.mubr.msk.f32.vlgmr.msra.gmra.mrb[2].mxu0 %vm95_vm0, %v63_v47 }
  0x4d   :  { %3824 = vmatpush3.bf16.msra.mxu1 %v3821_v27  ;;  %v465_v27 = vand.u32 1, %v459_v24 }
  0x4e   :  { %3826 = vmatprep.subr.bf16.mxu1 %v3825_v30 }
  0x4f   :  { %vm497_vm9 = vcmp.eq.s32.totalorder %v465_v27, %v489_v26 }
  0x51   :  { %3828 = vmatpush3.bf16.msra.mxu1 %v3825_v30  ;;  %v4462_v30 = vsel %vm497_vm9, 0.0, %v4278_v29 }
  0x52   :  { %3830 = vmatprep.subr.bf16.mxu1 %v3829_v33 }
  0x55   :  { %3832 = vmatpush3.bf16.msra.mxu1 %v3829_v33 }
  0x56   :  { %3834 = vmatprep.subr.bf16.mxu1 %v3833_v36 }
  0x59   :  { %3836 = vmatpush3.bf16.msra.mxu1 %v3833_v36 }
  0x5a   :  { %3838 = vmatprep.subr.bf16.mxu1 %v3837_v39 }
  0x5d   :  { %3840 = vmatpush3.bf16.msra.mxu1 %v3837_v39 }
 0x113   :  { %v3430_v49 = vpop.f32.mrb[0].mxu1 }
 0x114   :  { %v4368_v50 = vadd.f32 %v3430_v49, %v3127_v48  ;;  %v168_v51 = vpop.f32.mrb[1].mxu1 }
 0x115   :  { %v4370_v52 = vadd.f32 %v3127_v48, %v168_v51 }
 0x116   :  { %3114 = vst [vmem:[%s4670_s4 + $0x8] sm:$0xff] %v4368_v50  ;;  %v3476_v54 = vpop.f32.mrb[0].mxu0 }
 0x117   :  { %3113 = vst [vmem:[%s4670_s4] sm:$0xff] %v4370_v52  ;;  %3463 = vmatprep.mubr.f32.mxu1 %v4370_v52  ;;  %v360_v55 = vadd.f32 %v3476_v54, %v3131_v53  ;;  %v354_v56 = vpop.f32.mrb[1].mxu0 }
 0x118   :  { %3464 = vmatmul.mubr.f32.vlgmr.msra.gmra.mrb[2].mxu1 %v4368_v50  ;;  %v355_v57 = vadd.f32 %v3131_v53, %v354_v56 }
 0x11a   :  { %v4388_v59 = vpack.c.bf16 %v360_v55, %v355_v57 }
 0x11c   :  { %3859 = vmatprep.subr.msk.bf16.mxu0 %vm4384_vm1, %v4388_v59 }
 0x11d   :  { %3862 = vmatpush3.bf16.xpose.msk.msra.mxu0 %vm4384_vm1, %v4388_v59 }
 0x11e   :  { %3865 = vmatprep.subr.msk.bf16.mxu0 %vm4384_vm1, %v4388_v59  ;;  %v3487_v62 = vpop.f32.mrb[2].mxu0 }
 0x11f   :  { %v4404_v0 = vadd.f32 %v3487_v62, %v3134_v63  ;;  %v444_v1 = vpop.f32.mrb[3].mxu0 }
 0x120   :  { %v4412_v5 = vadd.f32 %v3134_v63, %v444_v1 }
 0x121   :  { %v721_v6 = vmul.f32 %v4410_v4, %v4404_v0  ;;  %v614_v7 = vmul.f32 %v4407_v3, %v4404_v0 }
 0x122   :  { %v720_v8 = vmul.f32 %v4410_v4, %v4412_v5  ;;  %v613_v9 = vmul.f32 %v4407_v3, %v4412_v5 }
 0x124   :  { %v3869_v10 = vpack.c.bf16 %v721_v6, %v720_v8  ;;  %v4422_v11 = vpack.c.bf16 %v614_v7, %v613_v9 }
 0x126   :  { %3870 = vmatprep.subr.bf16.mxu1 %v3869_v10 }
 0x127   :  { %3872 = vmatpush3.bf16.msra.mxu1 %v3869_v10 }
 0x128   :  { %3874 = vmatprep.subr.bf16.mxu1 %v4422_v11 }
 0x1eb   :  { %v3465_v13 = vpop.f32.mrb[2].mxu1 }
 0x1ec   :  { %v4425_v14 = vadd.f32 %v3465_v13, %v3130_v12  ;;  %v264_v15 = vpop.f32.mrb[3].mxu1 }
 0x1ed   :  { %v4427_v16 = vadd.f32 %v3130_v12, %v264_v15 }
 0x1ee   :  { %v502_v18 = vmul.f32 %v4407_v3, %v4425_v14  ;;  %v616_v21 = vmul.f32 %v4410_v4, %v4425_v14  ;;  %v885_v23 = vmul.f32 %v4447_v20, %v4425_v14 }
 0x1ef   :  { %v501_v17 = vmul.f32 %v4407_v3, %v4427_v16  ;;  %v615_v19 = vmul.f32 %v4410_v4, %v4427_v16  ;;  %v884_v22 = vmul.f32 %v4447_v20, %v4427_v16 }
 0x1f1   :  { %3492 = vmatprep.mubr.msk.f32.mxu0 %vm95_vm0, %v501_v17 }
 0x1f2   :  { %3493 = vmatmul.mubr.msk.f32.vlgmr.msra.gmra.mrb[4].mxu0 %vm95_vm0, %v502_v18 }
 0x1f3   :  { %3868 = vmatpush3.bf16.xpose.msk.msra.mxu0 %vm4384_vm1, %v4388_v59  ;;  %3499 = vmatprep.mubr.msk.f32.mxu0 %vm95_vm0, %v615_v19 }
 0x1f4   :  { %3879 = vmatprep.subr.msk.bf16.mxu0 %vm4384_vm1, %v4388_v59 }
 0x1fa   :  { %3500 = vmatmul.mubr.msk.f32.vlgmr.msra.gmra.mrb[6].mxu0 %vm95_vm0, %v616_v21 }
 0x1fb   :  { %3882 = vmatpush3.bf16.xpose.msk.msra.mxu0 %vm4384_vm1, %v4388_v59  ;;  %3520 = vmatprep.mubr.msk.f32.mxu0 %vm95_vm0, %v884_v22 }
 0x202   :  { %3521 = vmatmul.mubr.msk.f32.vlgmr.msra.gmra.mrb[8].mxu0 %vm95_vm0, %v885_v23 }
 0x2c5   :  { %v3494_v31 = vpop.f32.mrb[4].mxu0 }
 0x2c6   :  { %v581_v33 = vpop.f32.mrb[5].mxu0  ;;  %v587_v35 = vadd.f32 %v3494_v31, %v4464_v32 }
 0x2c7   :  { %v582_v34 = vadd.f32 %v581_v33, %v4462_v30 }
 0x2c8   :  { %v594_v38 = vsel %vm590_vm11, %v587_v35, -inf }
 0x2c9   :  { %v591_v36 = vsel %vm590_vm11, %v582_v34, -inf }
 0x2ca   :  { %592 = vmax.xlane.f32.xlu1 %v591_v36 }
 0x2cd   :  { %v3501_v37 = vpop.f32.mrb[6].mxu0 }
 0x2ce   :  { %v689_v39 = vpop.f32.mrb[7].mxu0  ;;  %595 = vmax.xlane.f32.xlu1 %v594_v38  ;;  %v695_v41 = vadd.f32 %v3501_v37, %v4464_v32 }
 0x2cf   :  { %v690_v40 = vadd.f32 %v689_v39, %v4462_v30 }
 0x2d0   :  { %v701_v44 = vsel %vm590_vm11, %v695_v41, -inf }
 0x2d1   :  { %v698_v42 = vsel %vm590_vm11, %v690_v40, -inf }
 0x2d2   :  { %699 = vmax.xlane.f32.xlu0 %v698_v42 }
 0x2d5   :  { %v3522_v43 = vpop.f32.mrb[8].mxu0 }
 0x2d6   :  { %v964_v45 = vadd.f32 %v3522_v43, %v4464_v32  ;;  %v958_v46 = vpop.f32.mrb[9].mxu0  ;;  %702 = vmax.xlane.f32.xlu0 %v701_v44 }
 0x2d7   :  { %v959_v47 = vadd.f32 %v958_v46, %v4462_v30 }
 0x2d8   :  { %v970_v48 = vsel %vm590_vm11, %v964_v45, -inf }
 0x2d9   :  { %971 = vmax.xlane.f32.xlu1 %v970_v48  ;;  %v967_v49 = vsel %vm590_vm11, %v959_v47, -inf }
 0x2da   :  { %968 = vmax.xlane.f32.xlu0 %v967_v49 }
 0x357   :  { %v593_v51 = vpop.xlane.xlu1 %592 }
 0x358   :  { %v597_v53 = vsub.f32 %v582_v34, %v593_v51 }
 0x35a   :  { %v599_v57 = vmul.f32 1.442695, %v597_v53  ;;  %v4500_v53 = vsel %vm83_vm14, 1.0, %v4277_v2 }
 0x35b   :  { %v596_v54 = vpop.xlane.xlu1 %595  ;;  %v1180_v61 = vmul.f32 %v4500_v53, %v4404_v0  ;;  %v1075_v2 = vmul.f32 %v4500_v53, %v4425_v14 }
 0x35c   :  { %v598_v60 = vsub.f32 %v587_v35, %v596_v54  ;;  %v1179_v54 = vmul.f32 %v4500_v53, %v4412_v5 }
 0x35e   :  { %v601_v6 = vmul.f32 1.442695, %v598_v60 }
 0x35f   :  { %v700_v55 = vpop.xlane.xlu0 %699 }
 0x360   :  { %v704_v56 = vsub.f32 %v690_v40, %v700_v55  ;;  %v989_v40 = vmul.f32 %v4447_v20, %v4412_v5 }
 0x362   :  { %v706_v62 = vmul.f32 1.442695, %v704_v56  ;;  %v1074_v56 = vmul.f32 %v4500_v53, %v4427_v16 }
 0x363   :  { %v703_v63 = vpop.xlane.xlu0 %702 }
 0x364   :  { %4128 = vpow2.f32 %v706_v62  ;;  %v705_v1 = vsub.f32 %v695_v41, %v703_v63  ;;  %v990_v41 = vmul.f32 %v4447_v20, %v4404_v0 }
 0x365   :  { %4130 = vpow2.f32 %v599_v57  ;;  %v3893_v57 = vpack.c.bf16 %v1180_v61, %v1179_v54  ;;  %v1351_v61 = vld [vmem:[#allocation6 + $0x238] sm:$0xff] }
 0x366   :  { %v708_v7 = vmul.f32 1.442695, %v705_v1  ;;  %v972_v8 = vpop.xlane.xlu1 %971  ;;  %v3883_v46 = vpack.c.bf16 %v990_v41, %v989_v40  ;;  %v1368_v40 = vld [vmem:[#allocation6 + $0x2c0] sm:$0xff] }
 0x367   :  { %v974_v9 = vsub.f32 %v964_v45, %v972_v8  ;;  %v969_v10 = vpop.xlane.xlu0 %968  ;;  %v1550_v41 = vld [vmem:[#allocation6 + $0x360] sm:$0xff] }
 0x368   :  { %4132 = vpow2.f32 %v708_v7  ;;  %v973_v12 = vsub.f32 %v959_v47, %v969_v10 }
 0x369   :  { %4134 = vpow2.f32 %v601_v6  ;;  %v977_v13 = vmul.f32 1.442695, %v974_v9 }
 0x36a   :  { %v975_v15 = vmul.f32 1.442695, %v973_v12 }
 0x36c   :  { %4136 = vpow2.f32 %v975_v15  ;;  %v453_v15 = vld [vmem:[#allocation6 + $0x100] sm:$0xff] }
 0x36d   :  { %4138 = vpow2.f32 %v977_v13 }
 0x36e   :  { %v4129_v17 = vpop.eup %4128 }
 0x36f   :  { %v710_v18 = vsel %vm590_vm11, %v4129_v17, 0.0  ;;  %v4131_v19 = vpop.eup %4130 }
 0x370   :  { %711 = vadd.xlane.f32.xlu0 %v710_v18  ;;  %v603_v23 = vsel %vm590_vm11, %v4131_v19, 0.0  ;;  %v455_v18 = vld [vmem:[#allocation6 + $0x110] sm:$0xff] }
 0x372   :  { %v4133_v21 = vpop.eup %4132 }
 0x373   :  { %v713_v22 = vsel %vm590_vm11, %v4133_v21, 0.0  ;;  %v4135_v24 = vpop.eup %4134 }
 0x374   :  { %714 = vadd.xlane.f32.xlu1 %v713_v22  ;;  %604 = vadd.xlane.f32.xlu0 %v603_v23  ;;  %v606_v27 = vsel %vm590_vm11, %v4135_v24, 0.0 }
 0x376   :  { %v4137_v25 = vpop.eup %4136 }
 0x377   :  { %v979_v26 = vsel %vm590_vm11, %v4137_v25, 0.0  ;;  %v4139_v28 = vpop.eup %4138 }
 0x378   :  { %980 = vadd.xlane.f32.xlu0 %v979_v26  ;;  %607 = vadd.xlane.f32.xlu1 %v606_v27  ;;  %v982_v29 = vsel %vm590_vm11, %v4139_v28, 0.0 }
 0x37c   :  { %983 = vadd.xlane.f32.xlu1 %v982_v29  ;;  %v1365_v29 = vld [vmem:[#allocation6 + $0x2a8] sm:$0xff] }
 0x3fd   :  { %v712_v31 = vpop.xlane.xlu0 %711 }
 0x3fe   :  { %4140 = vrcp.f32 %v712_v31  ;;  %v1366_v31 = vld [vmem:[#allocation6 + $0x2b0] sm:$0xff] }
 0x401   :  { %v605_v33 = vpop.xlane.xlu0 %604  ;;  %v715_v34 = vpop.xlane.xlu1 %714 }
 0x402   :  { %4142 = vrcp.f32 %v605_v33  ;;  %v1548_v33 = vld [vmem:[#allocation6 + $0x350] sm:$0xff] }
 0x403   :  { %4144 = vrcp.f32 %v715_v34  ;;  %v3905_v34 = vpack.c.bf16 %v1366_v31, %v1365_v29  ;;  %v1361_v29 = vld [vmem:[#allocation6 + $0x288] sm:$0xff]  ;;  %v1362_v31 = vld [vmem:[#allocation6 + $0x290] sm:$0xff] }
 0x405   :  { %v608_v35 = vpop.xlane.xlu1 %607  ;;  %v981_v36 = vpop.xlane.xlu0 %980 }
 0x406   :  { %4146 = vrcp.f32 %v608_v35  ;;  %v1549_v35 = vld [vmem:[#allocation6 + $0x358] sm:$0xff] }
 0x407   :  { %4148 = vrcp.f32 %v981_v36  ;;  %v3945_v36 = vpack.c.bf16 %v1549_v35, %v1548_v33  ;;  %v1544_v33 = vld [vmem:[#allocation6 + $0x330] sm:$0xff]  ;;  %v3937_v35 = vpack.c.bf16 %v1362_v31, %v1361_v29  ;;  %v3170_v31 = vld [vmem:[#allocation6 + $0x1a8] ss:$0 sm:$0xff] }
 0x408   :  { %v4141_v37 = vpop.eup %4140 }
 0x409   :  { %v718_v38 = vmul.f32 %v4141_v37, %v4129_v17  ;;  %v984_v45 = vpop.xlane.xlu1 %983  ;;  %v454_v17 = vld [vmem:[#allocation6 + $0x108] sm:$0xff] }
 0x40a   :  { %4150 = vrcp.f32 %v984_v45  ;;  %v1349_v45 = vld [vmem:[#allocation6 + $0x228] sm:$0xff] }
 0x40b   :  { %3506 = vmatprep.mubr.msk.f32.mxu1 %vm590_vm11, %v718_v38 }
 0x40c   :  { %v4143_v39 = vpop.eup %4142 }
 0x40d   :  { %v4145_v42 = vpop.eup %4144  ;;  %v611_v43 = vmul.f32 %v4143_v39, %v4131_v19  ;;  %v3897_v19 = vpack.c.bf16 %v454_v17, %v453_v15  ;;  %v1367_v39 = vld [vmem:[#allocation6 + $0x2b8] sm:$0xff]  ;;  %v1357_v15 = vld [vmem:[#allocation6 + $0x268] sm:$0xff]  ;;  %v1358_v17 = vld [vmem:[#allocation6 + $0x270] sm:$0xff] }
 0x40e   :  { %v719_v44 = vmul.f32 %v4145_v42, %v4133_v21  ;;  %v456_v21 = vld [vmem:[#allocation6 + $0x118] sm:$0xff]  ;;  %v3909_v42 = vpack.c.bf16 %v1368_v40, %v1367_v39  ;;  %v1546_v39 = vld [vmem:[#allocation6 + $0x340] sm:$0xff]  ;;  %v1547_v40 = vld [vmem:[#allocation6 + $0x348] sm:$0xff] }
 0x40f   :  { %v3901_v22 = vpack.c.bf16 %v456_v21, %v455_v18  ;;  %3898 = vmatprep.subr.bf16.mxu0 %v3897_v19  ;;  %v1540_v18 = vld [vmem:[#allocation6 + $0x310] sm:$0xff]  ;;  %v3929_v21 = vpack.c.bf16 %v1358_v17, %v1357_v15  ;;  %v3166_v17 = vld [vmem:[#allocation6 + $0x2c8] ss:$0 sm:$0xff] }
 0x410   :  { %3507 = vmatmul.mubr.msk.f32.vlgmr.msra.gmra.mrb[4].mxu1 %vm590_vm11, %v719_v44  ;;  %v4147_v47 = vpop.eup %4146  ;;  %3900 = vmatpush3.bf16.msra.mxu0 %v3897_v19  ;;  %v1541_v19 = vld [vmem:[#allocation6 + $0x318] sm:$0xff] }
 0x411   :  { %3876 = vmatpush3.bf16.msra.mxu1 %v4422_v11  ;;  %3513 = vmatprep.mubr.msk.f32.mxu1 %vm590_vm11, %v611_v43  ;;  %v4149_v48 = vpop.eup %4148  ;;  %v612_v49 = vmul.f32 %v4147_v47, %v4135_v24  ;;  %v1551_v43 = vld [vmem:[#allocation6 + $0x368] sm:$0xff]  ;;  %v1532_v47 = vld [vmem:[#allocation6 + $0x2d0] sm:$0xff] }
 0x412   :  { %3884 = vmatprep.subr.bf16.mxu1 %v3883_v46  ;;  %v987_v51 = vmul.f32 %v4149_v48, %v4137_v25  ;;  %3902 = vmatprep.subr.bf16.mxu0 %v3901_v22  ;;  %v3949_v44 = vpack.c.bf16 %v1551_v43, %v1550_v41  ;;  %v1709_v43 = vld [vmem:[#allocation6 + $0x128] sm:$0xff] }
 0x414   :  { %v4151_v11 = vpop.eup %4150  ;;  %3904 = vmatpush3.bf16.msra.mxu0 %v3901_v22  ;;  %v3969_v22 = vpack.c.bf16 %v1541_v19, %v1540_v18 }
 0x415   :  { %v988_v55 = vmul.f32 %v4151_v11, %v4139_v28  ;;  %3906 = vmatprep.subr.bf16.mxu0 %v3905_v34  ;;  %v3161_v11 = vld [vmem:[#allocation6 + $0x120] ss:$0 sm:$0xff] }
 0x418   :  { %3514 = vmatmul.mubr.msk.f32.vlgmr.msra.gmra.mrb[4].mxu1 %vm590_vm11, %v612_v49  ;;  %v1533_v49 = vld [vmem:[#allocation6 + $0x2d8] sm:$0xff] }
 0x419   :  { %3886 = vmatpush3.bf16.msra.mxu1 %v3883_v46  ;;  %3527 = vmatprep.mubr.msk.f32.mxu1 %vm590_vm11, %v987_v51  ;;  %v1350_v46 = vld [vmem:[#allocation6 + $0x230] sm:$0xff]  ;;  %v3953_v51 = vpack.c.bf16 %v1533_v49, %v1532_v47  ;;  %v1711_v49 = vld [vmem:[#allocation6 + $0x138] sm:$0xff] }
 0x41a   :  { %3889 = vmatprep.subr.msk.bf16.mxu1 %vm4384_vm1, %v4388_v59  ;;  %v3913_v48 = vpack.c.bf16 %v1350_v46, %v1349_v45  ;;  %v1805_v45 = vld [vmem:[#allocation6 + $0x1b0] sm:$0xff]  ;;  %v1806_v46 = vld [vmem:[#allocation6 + $0x1b8] sm:$0xff] }
 0x420   :  { %3528 = vmatmul.mubr.msk.f32.vlgmr.msra.gmra.mrb[4].mxu1 %vm590_vm11, %v988_v55 }
 0x421   :  { %3534 = vmatprep.mubr.msk.f32.mxu1 %vm95_vm0, %v1074_v56  ;;  %v1352_v56 = vld [vmem:[#allocation6 + $0x240] sm:$0xff] }
 0x422   :  { %3892 = vmatpush3.bf16.xpose.msk.msra.mxu1 %vm4384_vm1, %v4388_v59 }
 0x423   :  { %3894 = vmatprep.subr.bf16.mxu1 %v3893_v57 }
 0x429   :  { %3535 = vmatmul.mubr.msk.f32.vlgmr.msra.gmra.mrb[6].mxu1 %vm95_vm0, %v1075_v2  ;;  %v1535_v2 = vld [vmem:[#allocation6 + $0x2e8] sm:$0xff] }
 0x42a   :  { %3896 = vmatpush3.bf16.msra.mxu1 %v3893_v57  ;;  %v1534_v57 = vld [vmem:[#allocation6 + $0x2e0] sm:$0xff] }
 0x42b   :  { %3946 = vmatprep.subr.bf16.mxu1 %v3945_v36 }
 0x4fc   :  { %v3536_v0 = vpop.f32.mrb[6].mxu1 }
 0x4fd   :  { %v1154_v5 = vadd.f32 %v3536_v0, %v4464_v32  ;;  %v1148_v16 = vpop.f32.mrb[7].mxu1 }
 0x4fe   :  { %v1149_v60 = vadd.f32 %v1148_v16, %v4462_v30  ;;  %v1353_v16 = vld [vmem:[#allocation6 + $0x248] sm:$0xff] }
 0x4ff   :  { %v1160_v62 = vsel %vm590_vm11, %v1154_v5, -inf }
 0x500   :  { %1161 = vmax.xlane.f32.xlu1 %v1160_v62  ;;  %v1157_v63 = vsel %vm590_vm11, %v1149_v60, -inf  ;;  %v3957_v62 = vpack.c.bf16 %v1535_v2, %v1534_v57  ;;  %v1716_v57 = vld [vmem:[#allocation6 + $0x160] sm:$0xff] }
 0x501   :  { %1158 = vmax.xlane.f32.xlu0 %v1157_v63  ;;  %v1354_v63 = vld [vmem:[#allocation6 + $0x250] sm:$0xff] }
 0x58d   :  { %v1162_v59 = vpop.xlane.xlu1 %1161 }
 0x58e   :  { %v1164_v1 = vsub.f32 %v1154_v5, %v1162_v59  ;;  %v1159_v6 = vpop.xlane.xlu0 %1158  ;;  %v1536_v59 = vld [vmem:[#allocation6 + $0x2f0] sm:$0xff] }
 0x58f   :  { %v1163_v7 = vsub.f32 %v1149_v60, %v1159_v6  ;;  %v3917_v60 = vpack.c.bf16 %v1352_v56, %v1351_v61  ;;  %v3921_v6 = vpack.c.bf16 %v1354_v63, %v1353_v16  ;;  %v1714_v61 = vld [vmem:[#allocation6 + $0x150] sm:$0xff]  ;;  %v1715_v56 = vld [vmem:[#allocation6 + $0x158] sm:$0xff] }
 0x590   :  { %v1167_v14 = vmul.f32 1.442695, %v1164_v1  ;;  %v1537_v1 = vld [vmem:[#allocation6 + $0x2f8] sm:$0xff]  ;;  %v3997_v2 = vpack.c.bf16 %v1716_v57, %v1715_v56 }
 0x591   :  { %v1165_v8 = vmul.f32 1.442695, %v1163_v7  ;;  %v3961_v7 = vpack.c.bf16 %v1537_v1, %v1536_v59  ;;  %v1721_v59 = vld [vmem:[#allocation6 + $0x188] sm:$0xff] }
 0x592   :  { %4152 = vpow2.f32 %v1167_v14  ;;  %v1355_v14 = vld [vmem:[#allocation6 + $0x258] sm:$0xff] }
 0x593   :  { %4154 = vpow2.f32 %v1165_v8  ;;  %v1356_v8 = vld [vmem:[#allocation6 + $0x260] sm:$0xff] }
 0x59c   :  { %v4153_v9 = vpop.eup %4152 }
 0x59d   :  { %v4155_v10 = vpop.eup %4154  ;;  %v1172_v12 = vsel %vm590_vm11, %v4153_v9, 0.0 }
 0x59e   :  { %1173 = vadd.xlane.f32.xlu1 %v1172_v12  ;;  %v1169_v13 = vsel %vm590_vm11, %v4155_v10, 0.0  ;;  %v3925_v12 = vpack.c.bf16 %v1356_v8, %v1355_v14  ;;  %v1807_v8 = vld [vmem:[#allocation6 + $0x1c0] sm:$0xff] }
 0x59f   :  { %1170 = vadd.xlane.f32.xlu0 %v1169_v13 }
 0x62b   :  { %v1174_v23 = vpop.xlane.xlu1 %1173 }
 0x62c   :  { %4156 = vrcp.f32 %v1174_v23  ;;  %v1171_v24 = vpop.xlane.xlu0 %1170  ;;  %v1359_v23 = vld [vmem:[#allocation6 + $0x278] sm:$0xff] }
 0x62d   :  { %4158 = vrcp.f32 %v1171_v24  ;;  %v1360_v24 = vld [vmem:[#allocation6 + $0x280] sm:$0xff] }
 0x636   :  { %v4157_v25 = vpop.eup %4156 }
 0x637   :  { %v4159_v26 = vpop.eup %4158  ;;  %v1178_v28 = vmul.f32 %v4157_v25, %v4153_v9  ;;  %v1538_v9 = vld [vmem:[#allocation6 + $0x300] sm:$0xff] }
 0x638   :  { %v1177_v27 = vmul.f32 %v4159_v26, %v4155_v10  ;;  %v1539_v10 = vld [vmem:[#allocation6 + $0x308] sm:$0xff]  ;;  %v1542_v25 = vld [vmem:[#allocation6 + $0x320] sm:$0xff] }
 0x639   :  { %v3965_v13 = vpack.c.bf16 %v1539_v10, %v1538_v9  ;;  %v1543_v26 = vld [vmem:[#allocation6 + $0x328] sm:$0xff] }
 0x63a   :  { %3541 = vmatprep.mubr.msk.f32.mxu1 %vm590_vm11, %v1177_v27  ;;  %v3933_v27 = vpack.c.bf16 %v1360_v24, %v1359_v23  ;;  %v1808_v9 = vld [vmem:[#allocation6 + $0x1c8] sm:$0xff]  ;;  %v3169_v23 = vld [vmem:[#allocation6 + $0x370] ss:$0 sm:$0xff] }
 0x63b   :  { %3542 = vmatmul.mubr.msk.f32.vlgmr.msra.gmra.mrb[4].mxu1 %vm590_vm11, %v1178_v28  ;;  %v3973_v28 = vpack.c.bf16 %v1543_v26, %v1542_v25  ;;  %v4021_v10 = vpack.c.bf16 %v1808_v9, %v1807_v8 }
 0x63c   :  { %3948 = vmatpush3.bf16.msra.mxu1 %v3945_v36 }
 0x63d   :  { %3950 = vmatprep.subr.bf16.mxu1 %v3949_v44 }
 0x640   :  { %3952 = vmatpush3.bf16.msra.mxu1 %v3949_v44  ;;  %v1710_v44 = vld [vmem:[#allocation6 + $0x130] sm:$0xff] }
 0x641   :  { %3954 = vmatprep.subr.bf16.mxu1 %v3953_v51  ;;  %v3985_v47 = vpack.c.bf16 %v1710_v44, %v1709_v43  ;;  %v3174_v44 = vld [vmem:[#allocation6 + $0x1f8] ss:$0 sm:$0xff] }
 0x70e   :  { %v3543_v37 = vpop.f32.mrb[4].mxu1 }
 0x70f   :  { %v1253_v38 = vpop.f32.mrb[5].mxu1 }
 0x710   :  { %3552 = vmatprep.mubr.msk.f32.mxu0 %vm95_vm0, %v1253_v38  ;;  %v1364_v38 = vld [vmem:[#allocation6 + $0x2a0] sm:$0xff] }
 0x711   :  { %3553 = vmatmul.mubr.msk.f32.vlgmr.msra.gmra.mrb[10].mxu0 %vm95_vm0, %v3543_v37  ;;  %v1363_v37 = vld [vmem:[#allocation6 + $0x298] sm:$0xff] }
 0x712   :  { %3908 = vmatpush3.bf16.msra.mxu0 %v3905_v34  ;;  %v1545_v34 = vld [vmem:[#allocation6 + $0x338] sm:$0xff]  ;;  %v3941_v41 = vpack.c.bf16 %v1364_v38, %v1363_v37  ;;  %v3171_v38 = vld [vmem:[#allocation6 + $0x1d0] ss:$0 sm:$0xff] }
 0x713   :  { %3910 = vmatprep.subr.bf16.mxu0 %v3909_v42  ;;  %v3977_v36 = vpack.c.bf16 %v1545_v34, %v1544_v33 }
 0x716   :  { %3912 = vmatpush3.bf16.msra.mxu0 %v3909_v42  ;;  %v3981_v42 = vpack.c.bf16 %v1547_v40, %v1546_v39 }
 0x717   :  { %3914 = vmatprep.subr.bf16.mxu0 %v3913_v48 }
 0x7e4   :  { %v3554_v54 = vpop.f32.mrb[10].mxu0 }
 0x7e5   :  { %v1340_v55 = vpop.f32.mrb[11].mxu0  ;;  %v1346_v5 = vadd.f32 %v3554_v54, %v3161_v11  ;;  %v1713_v54 = vld [vmem:[#allocation6 + $0x148] sm:$0xff] }
 0x7e6   :  { %v1341_v0 = vadd.f32 %v3161_v11, %v1340_v55  ;;  %v3993_v55 = vpack.c.bf16 %v1714_v61, %v1713_v54 }
 0x7e8   :  { %3563 = vmatprep.mubr.msk.f32.mxu0 %vm95_vm0, %v1341_v0  ;;  %3609 = vmatprep.mubr.msk.f32.mxu1 %vm95_vm0, %v1341_v0  ;;  %v1717_v0 = vld [vmem:[#allocation6 + $0x168] sm:$0xff] }
 0x7e9   :  { %3564 = vmatmul.mubr.msk.f32.vlgmr.msra.gmra.mrb[12].mxu0 %vm95_vm0, %v1346_v5  ;;  %3610 = vmatmul.mubr.msk.f32.vlgmr.msra.gmra.mrb[8].mxu1 %vm95_vm0, %v1346_v5  ;;  %v1718_v5 = vld [vmem:[#allocation6 + $0x170] sm:$0xff] }
 0x7ea   :  { %3916 = vmatpush3.bf16.msra.mxu0 %v3913_v48  ;;  %3956 = vmatpush3.bf16.msra.mxu1 %v3953_v51  ;;  %v4017_v48 = vpack.c.bf16 %v1806_v46, %v1805_v45  ;;  %v1712_v51 = vld [vmem:[#allocation6 + $0x140] sm:$0xff]  ;;  %v4001_v16 = vpack.c.bf16 %v1718_v5, %v1717_v0 }
 0x7eb   :  { %3598 = vmatprep.mubr.f32.mxu0 %v4370_v52  ;;  %3644 = vmatprep.mubr.f32.mxu1 %v4370_v52  ;;  %v3989_v11 = vpack.c.bf16 %v1712_v51, %v1711_v49 }
 0x7ec   :  { %3918 = vmatprep.subr.bf16.mxu0 %v3917_v60  ;;  %3958 = vmatprep.subr.bf16.mxu1 %v3957_v62 }
 0x7ee   :  { %3920 = vmatpush3.bf16.msra.mxu0 %v3917_v60  ;;  %3960 = vmatpush3.bf16.msra.mxu1 %v3957_v62  ;;  %v1719_v60 = vld [vmem:[#allocation6 + $0x178] sm:$0xff]  ;;  %v1720_v62 = vld [vmem:[#allocation6 + $0x180] sm:$0xff] }
 0x7ef   :  { %3922 = vmatprep.subr.bf16.mxu0 %v3921_v6  ;;  %3962 = vmatprep.subr.bf16.mxu1 %v3961_v7  ;;  %v4005_v63 = vpack.c.bf16 %v1720_v62, %v1719_v60 }
 0x7f2   :  { %3924 = vmatpush3.bf16.msra.mxu0 %v3921_v6  ;;  %3964 = vmatpush3.bf16.msra.mxu1 %v3961_v7  ;;  %v1723_v6 = vld [vmem:[#allocation6 + $0x198] sm:$0xff]  ;;  %v1724_v7 = vld [vmem:[#allocation6 + $0x1a0] sm:$0xff] }
 0x7f3   :  { %3926 = vmatprep.subr.bf16.mxu0 %v3925_v12  ;;  %3966 = vmatprep.subr.bf16.mxu1 %v3965_v13  ;;  %v4013_v14 = vpack.c.bf16 %v1724_v7, %v1723_v6 }
 0x7f6   :  { %3928 = vmatpush3.bf16.msra.mxu0 %v3925_v12  ;;  %3968 = vmatpush3.bf16.msra.mxu1 %v3965_v13  ;;  %v1895_v12 = vld [vmem:[#allocation6 + $0x1d8] sm:$0xff]  ;;  %v1896_v13 = vld [vmem:[#allocation6 + $0x1e0] sm:$0xff] }
 0x7f7   :  { %3930 = vmatprep.subr.bf16.mxu0 %v3929_v21  ;;  %3970 = vmatprep.subr.bf16.mxu1 %v3969_v22  ;;  %v4025_v15 = vpack.c.bf16 %v1896_v13, %v1895_v12 }
 0x7fa   :  { %3932 = vmatpush3.bf16.msra.mxu0 %v3929_v21  ;;  %3972 = vmatpush3.bf16.msra.mxu1 %v3969_v22  ;;  %v1897_v21 = vld [vmem:[#allocation6 + $0x1e8] sm:$0xff]  ;;  %v1898_v22 = vld [vmem:[#allocation6 + $0x1f0] sm:$0xff] }
 0x7fb   :  { %3934 = vmatprep.subr.bf16.mxu0 %v3933_v27  ;;  %3974 = vmatprep.subr.bf16.mxu1 %v3973_v28 }
 0x7fe   :  { %3936 = vmatpush3.bf16.msra.mxu0 %v3933_v27  ;;  %3976 = vmatpush3.bf16.msra.mxu1 %v3973_v28  ;;  %v4029_v27 = vpack.c.bf16 %v1898_v22, %v1897_v21 }
 0x7ff   :  { %3938 = vmatprep.subr.bf16.mxu0 %v3937_v35  ;;  %3978 = vmatprep.subr.bf16.mxu1 %v3977_v36 }
 0x802   :  { %3940 = vmatpush3.bf16.msra.mxu0 %v3937_v35  ;;  %3980 = vmatpush3.bf16.msra.mxu1 %v3977_v36 }
 0x803   :  { %3942 = vmatprep.subr.bf16.mxu0 %v3941_v41  ;;  %3982 = vmatprep.subr.bf16.mxu1 %v3981_v42 }
 0x806   :  { %3944 = vmatpush3.bf16.msra.mxu0 %v3941_v41  ;;  %3984 = vmatpush3.bf16.msra.mxu1 %v3981_v42 }
 0x807   :  { %3986 = vmatprep.subr.bf16.mxu0 %v3985_v47  ;;  %4018 = vmatprep.subr.bf16.mxu1 %v4017_v48 }
 0x809   :  { %3599 = vmatmul.mubr.f32.vlgmr.msra.gmra.mrb[12].mxu0 %v4368_v50  ;;  %3645 = vmatmul.mubr.f32.vlgmr.msra.gmra.mrb[8].mxu1 %v4368_v50 }
 0x80a   :  { %3988 = vmatpush3.bf16.msra.mxu0 %v3985_v47  ;;  %3679 = vmatprep.mubr.f32.mxu0 %v4370_v52  ;;  %v1722_v52 = vld [vmem:[#allocation6 + $0x190] sm:$0xff] }
 0x80b   :  { %3990 = vmatprep.subr.bf16.mxu0 %v3989_v11  ;;  %4020 = vmatpush3.bf16.msra.mxu1 %v4017_v48  ;;  %v4009_v1 = vpack.c.bf16 %v1722_v52, %v1721_v59 }
 0x80c   :  { %4022 = vmatprep.subr.bf16.mxu1 %v4021_v10 }
 0x80e   :  { %3992 = vmatpush3.bf16.msra.mxu0 %v3989_v11 }
 0x80f   :  { %3994 = vmatprep.subr.bf16.mxu0 %v3993_v55  ;;  %4024 = vmatpush3.bf16.msra.mxu1 %v4021_v10 }
 0x810   :  { %4026 = vmatprep.subr.bf16.mxu1 %v4025_v15 }
 0x812   :  { %3996 = vmatpush3.bf16.msra.mxu0 %v3993_v55 }
 0x813   :  { %3998 = vmatprep.subr.bf16.mxu0 %v3997_v2 }
 0x816   :  { %4000 = vmatpush3.bf16.msra.mxu0 %v3997_v2 }
 0x817   :  { %4002 = vmatprep.subr.bf16.mxu0 %v4001_v16 }
 0x81a   :  { %4004 = vmatpush3.bf16.msra.mxu0 %v4001_v16 }
 0x81b   :  { %4006 = vmatprep.subr.bf16.mxu0 %v4005_v63 }
 0x81e   :  { %4008 = vmatpush3.bf16.msra.mxu0 %v4005_v63 }
 0x81f   :  { %4010 = vmatprep.subr.bf16.mxu0 %v4009_v1 }
 0x822   :  { %4012 = vmatpush3.bf16.msra.mxu0 %v4009_v1 }
 0x823   :  { %4014 = vmatprep.subr.bf16.mxu0 %v4013_v14 }
 0x826   :  { %4016 = vmatpush3.bf16.msra.mxu0 %v4013_v14 }
 0x829   :  { %3680 = vmatmul.mubr.f32.vlgmr.msra.gmra.mrb[14].mxu0 %v4368_v50 }
 0x8dc   :  { %v3600_v18 = vpop.f32.mrb[12].mxu0  ;;  %v3646_v19 = vpop.f32.mrb[8].mxu1 }
 0x8dd   :  { %v1516_v24 = vpop.f32.mrb[13].mxu0  ;;  %v1693_v25 = vpop.f32.mrb[9].mxu1  ;;  %v4538_v50 = vadd.f32 %v3600_v18, %v3166_v17  ;;  %v4548_v29 = vadd.f32 %v3646_v19, %v3169_v23 }
 0x8de   :  { %v4536_v26 = vadd.f32 %v3166_v17, %v1516_v24  ;;  %v4540_v28 = vadd.f32 %v3169_v23, %v1693_v25 }
 0x8e0   :  { %3690 = vmatprep.mubr.msk.f32.mxu1 %vm95_vm0, %v4536_v26 }
 0x8e1   :  { %3691 = vmatmul.mubr.msk.f32.vlgmr.msra.gmra.mrb[10].mxu1 %vm95_vm0, %v4538_v50 }
 0x8e2   :  { %4028 = vmatpush3.bf16.msra.mxu1 %v4025_v15  ;;  %3701 = vmatprep.mubr.msk.f32.mxu1 %vm95_vm0, %v4540_v28 }
 0x8e3   :  { %4030 = vmatprep.subr.bf16.mxu1 %v4029_v27 }
 0x8e6   :  { %4032 = vmatpush3.bf16.msra.mxu1 %v4029_v27 }
 0x8e9   :  { %3702 = vmatmul.mubr.msk.f32.vlgmr.msra.gmra.mrb[12].mxu1 %vm95_vm0, %v4548_v29 }
 0x8fc   :  { %v3681_v33 = vpop.f32.mrb[14].mxu0 }
 0x8fd   :  { %v1802_v34 = vadd.f32 %v3681_v33, %v3170_v31  ;;  %v1796_v35 = vpop.f32.mrb[15].mxu0 }
 0x8fe   :  { %v1797_v36 = vadd.f32 %v3170_v31, %v1796_v35 }
 0x8ff   :  { %v1991_v48 = vmul.f32 %v4407_v3, %v1802_v34  ;;  %v2373_v59 = vmul.f32 %v4447_v20, %v1802_v34 }
 0x900   :  { %v1990_v37 = vmul.f32 %v4407_v3, %v1797_v36  ;;  %v2103_v0 = vmul.f32 %v4410_v4, %v1797_v36  ;;  %v2372_v63 = vmul.f32 %v4447_v20, %v1797_v36  ;;  %v2562_v52 = vmul.f32 %v4500_v53, %v1797_v36 }
 0x902   :  { %3708 = vmatprep.mubr.msk.f32.mxu1 %vm95_vm0, %v1990_v37 }
 0x9b4   :  { %v3692_v39 = vpop.f32.mrb[10].mxu1 }
 0x9b5   :  { %v1892_v40 = vadd.f32 %v3692_v39, %v3171_v38  ;;  %v1886_v41 = vpop.f32.mrb[11].mxu1 }
 0x9b6   :  { %v1887_v42 = vadd.f32 %v3171_v38, %v1886_v41 }
 0x9b8   :  { %v4033_v43 = vpack.c.bf16 %v1892_v40, %v1887_v42 }
 0x9ba   :  { %4035 = vmatprep.subr.msk.bf16.mxu1 %vm4384_vm1, %v4033_v43 }
 0x9bb   :  { %4038 = vmatpush3.bf16.xpose.msk.msra.mxu1 %vm4384_vm1, %v4033_v43 }
 0x9bc   :  { %v3703_v45 = vpop.f32.mrb[12].mxu1  ;;  %4041 = vmatprep.subr.msk.bf16.mxu1 %vm4384_vm1, %v4033_v43 }
 0x9bd   :  { %v1982_v46 = vadd.f32 %v3703_v45, %v3174_v44  ;;  %v1976_v47 = vpop.f32.mrb[13].mxu1 }
 0x9be   :  { %v1977_v49 = vadd.f32 %v3174_v44, %v1976_v47 }
 0x9bf   :  { %v2209_v51 = vmul.f32 %v4410_v4, %v1982_v46  ;;  %v2102_v11 = vmul.f32 %v4407_v3, %v1982_v46  ;;  %v2478_v54 = vmul.f32 %v4447_v20, %v1982_v46  ;;  %v2668_v61 = vmul.f32 %v4500_v53, %v1982_v46 }
 0x9c0   :  { %v2208_v55 = vmul.f32 %v4410_v4, %v1977_v49  ;;  %v2101_v56 = vmul.f32 %v4407_v3, %v1977_v49  ;;  %v2477_v57 = vmul.f32 %v4447_v20, %v1977_v49  ;;  %v2667_v2 = vmul.f32 %v4500_v53, %v1977_v49 }
 0x9c1   :  { %v2104_v3 = vmul.f32 %v4410_v4, %v1802_v34  ;;  %v2563_v4 = vmul.f32 %v4500_v53, %v1802_v34 }
 0x9c2   :  { %3709 = vmatmul.mubr.msk.f32.vlgmr.msra.gmra.mrb[14].mxu1 %vm95_vm0, %v1991_v48  ;;  %v4045_v5 = vpack.c.bf16 %v2209_v51, %v2208_v55  ;;  %v4571_v16 = vpack.c.bf16 %v2102_v11, %v2101_v56  ;;  %v4573_v60 = vpack.c.bf16 %v2478_v54, %v2477_v57  ;;  %v4575_v62 = vpack.c.bf16 %v2668_v61, %v2667_v2 }
 0x9c3   :  { %4044 = vmatpush3.bf16.xpose.msk.msra.mxu1 %vm4384_vm1, %v4033_v43  ;;  %3715 = vmatprep.mubr.msk.f32.mxu1 %vm95_vm0, %v2103_v0 }
 0x9c4   :  { %4046 = vmatprep.subr.bf16.mxu0 %v4045_v5  ;;  %4055 = vmatprep.subr.msk.bf16.mxu1 %vm4384_vm1, %v4033_v43 }
 0x9c5   :  { %4048 = vmatpush3.bf16.msra.mxu0 %v4045_v5 }
 0x9c6   :  { %4050 = vmatprep.subr.bf16.mxu0 %v4571_v16 }
 0x9ca   :  { %3716 = vmatmul.mubr.msk.f32.vlgmr.msra.gmra.mrb[16].mxu1 %vm95_vm0, %v2104_v3 }
 0x9cb   :  { %4058 = vmatpush3.bf16.xpose.msk.msra.mxu1 %vm4384_vm1, %v4033_v43  ;;  %3736 = vmatprep.mubr.msk.f32.mxu1 %vm95_vm0, %v2372_v63 }
 0x9cc   :  { %4065 = vmatprep.subr.msk.bf16.mxu1 %vm4384_vm1, %v4033_v43 }
 0x9d2   :  { %3737 = vmatmul.mubr.msk.f32.vlgmr.msra.gmra.mrb[18].mxu1 %vm95_vm0, %v2373_v59 }
 0x9d3   :  { %4068 = vmatpush3.bf16.xpose.msk.msra.mxu1 %vm4384_vm1, %v4033_v43  ;;  %3750 = vmatprep.mubr.msk.f32.mxu1 %vm95_vm0, %v2562_v52 }
 0x9da   :  { %3751 = vmatmul.mubr.msk.f32.vlgmr.msra.gmra.mrb[20].mxu1 %vm95_vm0, %v2563_v4 }
 0xa95   :  { %v3710_v1 = vpop.f32.mrb[14].mxu1 }
 0xa96   :  { %v2070_v6 = vpop.f32.mrb[15].mxu1  ;;  %v2076_v9 = vadd.f32 %v3710_v1, %v4464_v32 }
 0xa97   :  { %v2071_v58 = vadd.f32 %v2070_v6, %v4462_v30 }
 0xa98   :  { %v2082_v53 = vsel %vm590_vm11, %v2076_v9, -inf }
 0xa99   :  { %v2079_v15 = vsel %vm590_vm11, %v2071_v58, -inf }
 0xa9d   :  { %v3717_v7 = vpop.f32.mrb[16].mxu1 }
 0xa9e   :  { %v2183_v14 = vadd.f32 %v3717_v7, %v4464_v32  ;;  %v2177_v8 = vpop.f32.mrb[17].mxu1 }
 0xa9f   :  { %v2178_v20 = vadd.f32 %v2177_v8, %v4462_v30 }
 0xaa0   :  { %v2189_v10 = vsel %vm590_vm11, %v2183_v14, -inf }
 0xaa1   :  { %2190 = vmax.xlane.f32.xlu1 %v2189_v10  ;;  %v2186_v12 = vsel %vm590_vm11, %v2178_v20, -inf }
 0xaa2   :  { %2187 = vmax.xlane.f32.xlu0 %v2186_v12 }
 0xaa5   :  { %2083 = vmax.xlane.f32.xlu1 %v2082_v53  ;;  %v3738_v13 = vpop.f32.mrb[18].mxu1 }
 0xaa6   :  { %v2452_v17 = vadd.f32 %v3738_v13, %v4464_v32  ;;  %v2446_v18 = vpop.f32.mrb[19].mxu1  ;;  %2080 = vmax.xlane.f32.xlu0 %v2079_v15 }
 0xaa7   :  { %v2447_v19 = vadd.f32 %v2446_v18, %v4462_v30 }
 0xaa8   :  { %v2458_v21 = vsel %vm590_vm11, %v2452_v17, -inf }
 0xaa9   :  { %2459 = vmax.xlane.f32.xlu1 %v2458_v21  ;;  %v2455_v22 = vsel %vm590_vm11, %v2447_v19, -inf }
 0xaaa   :  { %2456 = vmax.xlane.f32.xlu0 %v2455_v22 }
 0xaad   :  { %v3752_v23 = vpop.f32.mrb[20].mxu1 }
 0xaae   :  { %v2642_v24 = vadd.f32 %v3752_v23, %v4464_v32  ;;  %v2636_v25 = vpop.f32.mrb[21].mxu1 }
 0xaaf   :  { %v2637_v27 = vadd.f32 %v2636_v25, %v4462_v30 }
 0xab0   :  { %v2648_v31 = vsel %vm590_vm11, %v2642_v24, -inf }
 0xab1   :  { %2649 = vmax.xlane.f32.xlu1 %v2648_v31  ;;  %v2645_v33 = vsel %vm590_vm11, %v2637_v27, -inf }
 0xab2   :  { %2646 = vmax.xlane.f32.xlu0 %v2645_v33 }
 0xb2e   :  { %v2191_v34 = vpop.xlane.xlu1 %2190 }
 0xb2f   :  { %v2193_v35 = vsub.f32 %v2183_v14, %v2191_v34  ;;  %v2188_v36 = vpop.xlane.xlu0 %2187 }
 0xb30   :  { %v2192_v37 = vsub.f32 %v2178_v20, %v2188_v36  ;;  %v1986_v36 = vld [vmem:[#allocation6 + $0x208] sm:$0xff] }
 0xb31   :  { %v2196_v38 = vmul.f32 1.442695, %v2193_v35  ;;  %v1985_v35 = vld [vmem:[#allocation6 + $0x200] sm:$0xff] }
 0xb32   :  { %v2194_v39 = vmul.f32 1.442695, %v2192_v37  ;;  %v2084_v40 = vpop.xlane.xlu1 %2083 }
 0xb33   :  { %4160 = vpow2.f32 %v2196_v38  ;;  %v2086_v41 = vsub.f32 %v2076_v9, %v2084_v40  ;;  %v2081_v42 = vpop.xlane.xlu0 %2080 }
 0xb34   :  { %4162 = vpow2.f32 %v2194_v39  ;;  %v2085_v32 = vsub.f32 %v2071_v58, %v2081_v42  ;;  %v4073_v39 = vpack.c.bf16 %v1986_v36, %v1985_v35  ;;  %v1988_v42 = vld [vmem:[#allocation6 + $0x218] sm:$0xff]  ;;  %v3205_v35 = vld [vmem:[#allocation6 + $0x380] ss:$0 sm:$0xff] }
 0xb35   :  { %v2089_v43 = vmul.f32 1.442695, %v2086_v41 }
 0xb36   :  { %v2087_v30 = vmul.f32 1.442695, %v2085_v32  ;;  %v2460_v44 = vpop.xlane.xlu1 %2459 }
 0xb37   :  { %4164 = vpow2.f32 %v2089_v43  ;;  %v2462_v45 = vsub.f32 %v2452_v17, %v2460_v44  ;;  %v2457_v46 = vpop.xlane.xlu0 %2456 }
 0xb38   :  { %4166 = vpow2.f32 %v2087_v30  ;;  %v2461_v47 = vsub.f32 %v2447_v19, %v2457_v46 }
 0xb39   :  { %v2465_v48 = vmul.f32 1.442695, %v2462_v45 }
 0xb3a   :  { %v2463_v49 = vmul.f32 1.442695, %v2461_v47 }
 0xb3b   :  { %4168 = vpow2.f32 %v2465_v48 }
 0xb3c   :  { %4170 = vpow2.f32 %v2463_v49  ;;  %v4200_v49 = vld [vmem:[%s4670_s4 + $0x8] sm:$0xff] }
 0xb3d   :  { %v4161_v51 = vpop.eup %4160 }
 0xb3e   :  { %v4163_v11 = vpop.eup %4162  ;;  %v2650_v54 = vpop.xlane.xlu1 %2649  ;;  %v2201_v61 = vsel %vm590_vm11, %v4161_v51, 0.0 }
 0xb3f   :  { %v2652_v55 = vsub.f32 %v2642_v24, %v2650_v54  ;;  %2202 = vadd.xlane.f32.xlu1 %v2201_v61  ;;  %v2647_v56 = vpop.xlane.xlu0 %2646  ;;  %v2198_v57 = vsel %vm590_vm11, %v4163_v11, 0.0 }
 0xb40   :  { %v2651_v2 = vsub.f32 %v2637_v27, %v2647_v56  ;;  %2199 = vadd.xlane.f32.xlu0 %v2198_v57 }
 0xb41   :  { %v4165_v0 = vpop.eup %4164  ;;  %v2655_v5 = vmul.f32 1.442695, %v2652_v55 }
 0xb42   :  { %v4167_v3 = vpop.eup %4166  ;;  %v2653_v63 = vmul.f32 1.442695, %v2651_v2  ;;  %v2094_v59 = vsel %vm590_vm11, %v4165_v0, 0.0 }
 0xb43   :  { %4172 = vpow2.f32 %v2655_v5  ;;  %2095 = vadd.xlane.f32.xlu1 %v2094_v59  ;;  %v2091_v52 = vsel %vm590_vm11, %v4167_v3, 0.0 }
 0xb44   :  { %4174 = vpow2.f32 %v2653_v63  ;;  %2092 = vadd.xlane.f32.xlu0 %v2091_v52 }
 0xb45   :  { %v4169_v4 = vpop.eup %4168 }
 0xb46   :  { %v4171_v1 = vpop.eup %4170  ;;  %v2470_v6 = vsel %vm590_vm11, %v4169_v4, 0.0 }
 0xb47   :  { %2471 = vadd.xlane.f32.xlu1 %v2470_v6  ;;  %v2467_v7 = vsel %vm590_vm11, %v4171_v1, 0.0  ;;  %v2885_v6 = vld [vmem:[#allocation6 + $0x390] sm:$0xff] }
 0xb48   :  { %2468 = vadd.xlane.f32.xlu0 %v2467_v7 }
 0xb4d   :  { %v4173_v14 = vpop.eup %4172 }
 0xb4e   :  { %v4175_v8 = vpop.eup %4174  ;;  %v2660_v20 = vsel %vm590_vm11, %v4173_v14, 0.0 }
 0xb4f   :  { %2661 = vadd.xlane.f32.xlu1 %v2660_v20  ;;  %v2657_v9 = vsel %vm590_vm11, %v4175_v8, 0.0 }
 0xb50   :  { %2658 = vadd.xlane.f32.xlu0 %v2657_v9  ;;  %v2976_v9 = vld [vmem:[#allocation6 + $0x3b0] sm:$0xff] }
 0xbcc   :  { %v2203_v10 = vpop.xlane.xlu1 %2202 }
 0xbcd   :  { %4176 = vrcp.f32 %v2203_v10  ;;  %v2200_v58 = vpop.xlane.xlu0 %2199  ;;  %v2977_v10 = vld [vmem:[#allocation6 + $0x3b8] sm:$0xff] }
 0xbce   :  { %4178 = vrcp.f32 %v2200_v58  ;;  %v2978_v58 = vld [vmem:[#allocation6 + $0x3c0] sm:$0xff] }
 0xbd0   :  { %v2096_v53 = vpop.xlane.xlu1 %2095 }
 0xbd1   :  { %v2093_v12 = vpop.xlane.xlu0 %2092 }
 0xbd2   :  { %4180 = vrcp.f32 %v2093_v12  ;;  %v4089_v12 = vpack.c.bf16 %v2977_v10, %v2976_v9  ;;  %v3213_v9 = vld [vmem:[#allocation6 + $0x400] ss:$0 sm:$0xff] }
 0xbd3   :  { %4182 = vrcp.f32 %v2096_v53  ;;  %v2979_v53 = vld [vmem:[#allocation6 + $0x3c8] sm:$0xff] }
 0xbd4   :  { %v2472_v21 = vpop.xlane.xlu1 %2471 }
 0xbd5   :  { %v2469_v13 = vpop.xlane.xlu0 %2468 }
 0xbd6   :  { %4184 = vrcp.f32 %v2469_v13  ;;  %v4093_v13 = vpack.c.bf16 %v2979_v53, %v2978_v58 }
 0xbd7   :  { %v4177_v15 = vpop.eup %4176  ;;  %4186 = vrcp.f32 %v2472_v21 }
 0xbd8   :  { %v4179_v17 = vpop.eup %4178  ;;  %v2207_v19 = vmul.f32 %v4177_v15, %v4161_v51  ;;  %v2980_v15 = vld [vmem:[#allocation6 + $0x3d0] sm:$0xff] }
 0xbd9   :  { %v2206_v18 = vmul.f32 %v4179_v17, %v4163_v11  ;;  %v4201_v11 = vld [vmem:[%s4670_s4] sm:$0xff]  ;;  %v2981_v17 = vld [vmem:[#allocation6 + $0x3d8] sm:$0xff] }
 0xbdb   :  { %3722 = vmatprep.mubr.msk.f32.mxu0 %vm590_vm11, %v2206_v18  ;;  %v4097_v18 = vpack.c.bf16 %v2981_v17, %v2980_v15 }
 0xbdc   :  { %v4181_v22 = vpop.eup %4180  ;;  %3723 = vmatmul.mubr.msk.f32.vlgmr.msra.gmra.mrb[16].mxu0 %vm590_vm11, %v2207_v19  ;;  %v2662_v33 = vpop.xlane.xlu1 %2661 }
 0xbdd   :  { %4052 = vmatpush3.bf16.msra.mxu0 %v4571_v16  ;;  %v2659_v23 = vpop.xlane.xlu0 %2658  ;;  %v2099_v24 = vmul.f32 %v4181_v22, %v4167_v3  ;;  %v4183_v25 = vpop.eup %4182 }
 0xbde   :  { %4060 = vmatprep.subr.bf16.mxu0 %v4573_v60  ;;  %4188 = vrcp.f32 %v2659_v23  ;;  %v2100_v31 = vmul.f32 %v4183_v25, %v4165_v0 }
 0xbdf   :  { %3729 = vmatprep.mubr.msk.f32.mxu0 %vm590_vm11, %v2099_v24  ;;  %4190 = vrcp.f32 %v2662_v33 }
 0xbe0   :  { %v4185_v27 = vpop.eup %4184 }
 0xbe1   :  { %v2475_v34 = vmul.f32 %v4185_v27, %v4171_v1  ;;  %v4187_v16 = vpop.eup %4186 }
 0xbe2   :  { %v2476_v38 = vmul.f32 %v4187_v16, %v4169_v4 }
 0xbe4   :  { %3730 = vmatmul.mubr.msk.f32.vlgmr.msra.gmra.mrb[16].mxu0 %vm590_vm11, %v2100_v31  ;;  %v3204_v31 = vld [vmem:[#allocation6 + $0x378] ss:$0 sm:$0xff] }
 0xbe5   :  { %4062 = vmatpush3.bf16.msra.mxu0 %v4573_v60  ;;  %3743 = vmatprep.mubr.msk.f32.mxu0 %vm590_vm11, %v2475_v34  ;;  %v1987_v60 = vld [vmem:[#allocation6 + $0x210] sm:$0xff] }
 0xbe6   :  { %4070 = vmatprep.subr.bf16.mxu0 %v4575_v62  ;;  %v4077_v43 = vpack.c.bf16 %v1988_v42, %v1987_v60  ;;  %v3206_v42 = vld [vmem:[#allocation6 + $0x3a8] ss:$0 sm:$0xff] }
 0xbe8   :  { %v4189_v37 = vpop.eup %4188 }
 0xbe9   :  { %v2665_v40 = vmul.f32 %v4189_v37, %v4175_v8  ;;  %v4191_v41 = vpop.eup %4190  ;;  %v2887_v8 = vld [vmem:[#allocation6 + $0x3a0] sm:$0xff] }
 0xbea   :  { %v2666_v32 = vmul.f32 %v4191_v41, %v4173_v14  ;;  %v2886_v14 = vld [vmem:[#allocation6 + $0x398] sm:$0xff]  ;;  %v2983_v41 = vld [vmem:[#allocation6 + $0x3e8] sm:$0xff] }
 0xbeb   :  { %v4085_v20 = vpack.c.bf16 %v2887_v8, %v2886_v14  ;;  %v3212_v14 = vld [vmem:[#allocation6 + $0x3f8] ss:$0 sm:$0xff] }
 0xbec   :  { %3744 = vmatmul.mubr.msk.f32.vlgmr.msra.gmra.mrb[16].mxu0 %vm590_vm11, %v2476_v38 }
 0xbed   :  { %4072 = vmatpush3.bf16.msra.mxu0 %v4575_v62  ;;  %3757 = vmatprep.mubr.msk.f32.mxu0 %vm590_vm11, %v2665_v40  ;;  %v3201_v62 = vld [vmem:[#allocation6 + $0x220] ss:$0 sm:$0xff] }
 0xbee   :  { %4074 = vmatprep.subr.bf16.mxu0 %v4073_v39  ;;  %v2982_v40 = vld [vmem:[#allocation6 + $0x3e0] sm:$0xff] }
 0xbef   :  { %v4101_v60 = vpack.c.bf16 %v2983_v41, %v2982_v40 }
 0xbf4   :  { %3758 = vmatmul.mubr.msk.f32.vlgmr.msra.gmra.mrb[16].mxu0 %vm590_vm11, %v2666_v32 }
 0xbf5   :  { %4076 = vmatpush3.bf16.msra.mxu0 %v4073_v39 }
 0xbf6   :  { %4078 = vmatprep.subr.bf16.mxu0 %v4077_v43 }
 0xbf9   :  { %4080 = vmatpush3.bf16.msra.mxu0 %v4077_v43 }
 0xbfa   :  { %4090 = vmatprep.subr.bf16.mxu0 %v4089_v12 }
 0xcc7   :  { %v3759_v30 = vpop.f32.mrb[16].mxu0 }
 0xcc8   :  { %v2741_v44 = vpop.f32.mrb[17].mxu0 }
 0xcc9   :  { %3768 = vmatprep.mubr.msk.f32.mxu0 %vm95_vm0, %v2741_v44 }
 0xcca   :  { %3769 = vmatmul.mubr.msk.f32.vlgmr.msra.gmra.mrb[18].mxu0 %vm95_vm0, %v3759_v30 }
 0xccb   :  { %4092 = vmatpush3.bf16.msra.mxu0 %v4089_v12 }
 0xccc   :  { %4094 = vmatprep.subr.bf16.mxu0 %v4093_v13 }
 0xccf   :  { %4096 = vmatpush3.bf16.msra.mxu0 %v4093_v13 }
 0xcd0   :  { %4098 = vmatprep.subr.bf16.mxu0 %v4097_v18 }
 0xcd3   :  { %4100 = vmatpush3.bf16.msra.mxu0 %v4097_v18 }
 0xcd4   :  { %4102 = vmatprep.subr.bf16.mxu0 %v4101_v60 }
 0xcd7   :  { %4104 = vmatpush3.bf16.msra.mxu0 %v4101_v60 }
 0xd9d   :  { %v3770_v45 = vpop.f32.mrb[18].mxu0 }
 0xd9e   :  { %v2834_v46 = vadd.f32 %v3770_v45, %v3201_v62  ;;  %v2828_v47 = vpop.f32.mrb[19].mxu0 }
 0xd9f   :  { %v2829_v48 = vadd.f32 %v3201_v62, %v2828_v47 }
 0xda0   :  { %v2838_v51 = vadd.f32 %v4200_v49, %v2834_v46  ;;  %v3209_v46 = vld [vmem:[#allocation6 + $0x3f0] ss:$0 sm:$0xff] }
 0xda1   :  { %v2837_v54 = vadd.f32 %v4201_v11, %v2829_v48 }
 0xda2   :  { %v2840_v61 = vadd.f32 %v2838_v51, %v4538_v50 }
 0xda3   :  { %v2839_v55 = vadd.f32 %v2837_v54, %v4536_v26 }
 0xda4   :  { %v2842_v56 = vadd.f32 %v2840_v61, %v4548_v29 }
 0xda5   :  { %v2841_v57 = vadd.f32 %v2839_v55, %v4540_v28  ;;  %v2884_v28 = vld [vmem:[#allocation6 + $0x388] sm:$0xff] }
 0xda6   :  { %v2848_v2 = vsel %vm95_vm0, %v2842_v56, 0.0  ;;  %v4081_v7 = vpack.c.bf16 %v2885_v6, %v2884_v28 }
 0xda7   :  { %2849 = vadd.xlane.f32.xlu1 %v2848_v2  ;;  %v2845_v0 = vsel %vm95_vm0, %v2841_v57, 0.0 }
 0xda8   :  { %2846 = vadd.xlane.f32.xlu0 %v2845_v0  ;;  %4082 = vmatprep.subr.bf16.mxu1 %v4081_v7 }
 0xda9   :  { %4084 = vmatpush3.bf16.msra.mxu1 %v4081_v7 }
 0xdaa   :  { %4086 = vmatprep.subr.bf16.mxu1 %v4085_v20 }
 0xdad   :  { %4088 = vmatpush3.bf16.msra.mxu1 %v4085_v20 }
 0xe34   :  { %v2850_v5 = vpop.xlane.xlu1 %2849 }
 0xe35   :  { %v2853_v3 = vmul.f32 0.03125, %v2850_v5  ;;  %v2847_v63 = vpop.xlane.xlu0 %2846 }
 0xe36   :  { %v2852_v59 = vmul.f32 0.03125, %v2847_v63 }
 0xe37   :  { %v2855_v52 = vsub.f32 %v2842_v56, %v2853_v3 }
 0xe38   :  { %v2854_v4 = vsub.f32 %v2841_v57, %v2852_v59 }
 0xe39   :  { %v2857_v1 = vmul.f32 %v2855_v52, %v2855_v52 }
 0xe3a   :  { %v2856_v50 = vmul.f32 %v2854_v4, %v2854_v4 }
 0xe3b   :  { %v2861_v26 = vsel %vm95_vm0, %v2857_v1, 0.0 }
 0xe3c   :  { %2862 = vadd.xlane.f32.xlu1 %v2861_v26  ;;  %v2858_v29 = vsel %vm95_vm0, %v2856_v50, 0.0 }
 0xe3d   :  { %2859 = vadd.xlane.f32.xlu0 %v2858_v29 }
 0xec9   :  { %v2863_v19 = vpop.xlane.xlu1 %2862 }
 0xeca   :  { %v2865_v21 = vmul.f32 0.03125, %v2863_v19  ;;  %v2860_v22 = vpop.xlane.xlu0 %2859 }
 0xecb   :  { %v2864_v23 = vmul.f32 0.03125, %v2860_v22 }
 0xecc   :  { %v2867_v24 = vadd.f32 1e-12, %v2865_v21 }
 0xecd   :  { %v2866_v25 = vadd.f32 1e-12, %v2864_v23 }
 0xece   :  { %4192 = vrsqrt.f32 %v2867_v24 }
 0xecf   :  { %4194 = vrsqrt.f32 %v2866_v25 }
 0xed8   :  { %v4193_v27 = vpop.eup %4192 }
 0xed9   :  { %v4195_v33 = vpop.eup %4194  ;;  %v2871_v34 = vmul.f32 %v4193_v27, %v2855_v52 }
 0xeda   :  { %v2870_v16 = vmul.f32 %v4195_v33, %v2854_v4 }
 0xedb   :  { %v2877_v36 = vmul.f32 %v3204_v31, %v2871_v34 }
 0xedc   :  { %v2876_v37 = vmul.f32 %v3204_v31, %v2870_v16 }
 0xedd   :  { %v2883_v39 = vadd.f32 %v3205_v35, %v2877_v36 }
 0xede   :  { %v2882_v38 = vadd.f32 %v3205_v35, %v2876_v37 }
 0xee0   :  { %3779 = vmatprep.mubr.msk.f32.mxu1 %vm95_vm0, %v2882_v38 }
 0xee1   :  { %3780 = vmatmul.mubr.msk.f32.vlgmr.msra.gmra.mrb[22].mxu1 %vm95_vm0, %v2883_v39 }
 0xfb4   :  { %v3781_v32 = vpop.f32.mrb[22].mxu1 }
 0xfb5   :  { %v2971_v43 = vadd.f32 %v3781_v32, %v3206_v42  ;;  %v2965_v30 = vpop.f32.mrb[23].mxu1 }
 0xfb6   :  { %v2966_v44 = vadd.f32 %v3206_v42, %v2965_v30 }
 0xfb7   :  { %v2975_v45 = vmax.f32 %v2971_v43, 0.0 }
 0xfb8   :  { %v2974_v62 = vmax.f32 %v2966_v44, 0.0 }
 0xfba   :  { %3798 = vmatprep.mubr.msk.f32.mxu0 %vm2989_vm15, %v2974_v62 }
 0xfbb   :  { %3799 = vmatmul.mubr.msk.f32.vlgmr.msra.gmra.mrb[20].mxu0 %vm2989_vm15, %v2975_v45 }
0x108e   :  { %v3800_v47 = vpop.f32.mrb[20].mxu0 }
0x108f   :  { %v3068_v48 = vadd.f32 %v3800_v47, %v3209_v46  ;;  %v3062_v49 = vpop.f32.mrb[21].mxu0 }
0x1090   :  { %v3063_v51 = vadd.f32 %v3209_v46, %v3062_v49 }
0x1091   :  { %v3072_v11 = vadd.f32 %v3068_v48, %v2883_v39 }
0x1092   :  { %v3071_v54 = vadd.f32 %v3063_v51, %v2882_v38 }
0x1093   :  { %v3078_v61 = vsel %vm95_vm0, %v3072_v11, 0.0 }
0x1094   :  { %3079 = vadd.xlane.f32.xlu1 %v3078_v61  ;;  %v3075_v55 = vsel %vm95_vm0, %v3071_v54, 0.0 }
0x1095   :  { %3076 = vadd.xlane.f32.xlu0 %v3075_v55 }
0x1121   :  { %v3080_v56 = vpop.xlane.xlu1 %3079 }
0x1122   :  { %v3082_v57 = vmul.f32 0.03125, %v3080_v56  ;;  %v3077_v2 = vpop.xlane.xlu0 %3076 }
0x1123   :  { %v3081_v0 = vmul.f32 0.03125, %v3077_v2 }
0x1124   :  { %v3084_v5 = vsub.f32 %v3072_v11, %v3082_v57 }
0x1125   :  { %v3083_v3 = vsub.f32 %v3071_v54, %v3081_v0 }
0x1126   :  { %v3086_v63 = vmul.f32 %v3084_v5, %v3084_v5 }
0x1127   :  { %v3085_v59 = vmul.f32 %v3083_v3, %v3083_v3 }
0x1128   :  { %v3090_v52 = vsel %vm95_vm0, %v3086_v63, 0.0 }
0x1129   :  { %3091 = vadd.xlane.f32.xlu1 %v3090_v52  ;;  %v3087_v4 = vsel %vm95_vm0, %v3085_v59, 0.0 }
0x112a   :  { %3088 = vadd.xlane.f32.xlu0 %v3087_v4 }
0x11b6   :  { %v3092_v1 = vpop.xlane.xlu1 %3091 }
0x11b7   :  { %v3094_v50 = vmul.f32 0.03125, %v3092_v1  ;;  %v3089_v26 = vpop.xlane.xlu0 %3088 }
0x11b8   :  { %v3093_v29 = vmul.f32 0.03125, %v3089_v26 }
0x11b9   :  { %v3096_v28 = vadd.f32 1e-12, %v3094_v50 }
0x11ba   :  { %v3095_v6 = vadd.f32 1e-12, %v3093_v29 }
0x11bb   :  { %4196 = vrsqrt.f32 %v3096_v28 }
0x11bc   :  { %4198 = vrsqrt.f32 %v3095_v6 }
0x11c5   :  { %v4197_v7 = vpop.eup %4196 }
0x11c6   :  { %v4199_v8 = vpop.eup %4198  ;;  %v3100_v20 = vmul.f32 %v4197_v7, %v3084_v5 }
0x11c7   :  { %v3099_v10 = vmul.f32 %v4199_v8, %v3083_v3 }
0x11c8   :  { %v3106_v58 = vmul.f32 %v3212_v14, %v3100_v20 }
0x11c9   :  { %v3105_v12 = vmul.f32 %v3212_v14, %v3099_v10 }
0x11ca   :  { %v3112_v53 = vadd.f32 %v3213_v9, %v3106_v58 }
0x11cb   :  { %v3111_v13 = vadd.f32 %v3213_v9, %v3105_v12 }
0x11cc   :  { %3116 = vst.msk [vmem:[%s4670_s4 + $0x8] sm:$0xff] %vm95_vm0, %v3112_v53 }
0x11cd   :  { %3115 = vst.msk [vmem:[%s4670_s4] sm:$0xff] %vm95_vm0, %v3111_v13 }
0x11ce   :  { %3121 = vsyncpa [#allocation3], 1 }
0x11cf   :  { %3122 = vsyncpa [#allocation5], 1 }

</bundles_post_ra>
